<compile_context>
chip_gen: v5e
topology: v5e:2x2
jax: 0.10.0
libtpu: 0.0.40
codegen_flags: <defaults>
</compile_context>

<pallas_src>
import jax
import jax.numpy as jnp
from jax.experimental import pallas as pl
from jax.experimental.pallas import tpu as pltpu
import numpy as np

N_PAD = 128  # lane-padded width of the final (256 -> 1) layer


def _leaky_relu(x, slope=0.2):
    return jnp.where(x >= 0, x, slope * x)


def discriminator_kernel(x_ref, w1_ref, b1_ref, w2_ref, b2_ref, w3_ref, b3_ref, o_ref):
    # x_ref: (TB, D) bf16 tile of the flattened batch; weights bf16, biases f32.
    x = x_ref[...]

    h1 = jnp.dot(x, w1_ref[...], preferred_element_type=jnp.float32)     # (TB, 512) f32
    h1 = _leaky_relu(h1 + b1_ref[...])

    h2 = jnp.dot(h1.astype(jnp.bfloat16), w2_ref[...],
                 preferred_element_type=jnp.float32)                     # (TB, 256) f32
    h2 = _leaky_relu(h2 + b2_ref[...])

    # Final layer padded to 128 lanes -> lane-dense MXU result and unmasked stores.
    h3 = jnp.dot(h2.astype(jnp.bfloat16), w3_ref[...],
                 preferred_element_type=jnp.float32)                     # (TB, 128) f32
    h3 = h3 + b3_ref[...]

    o_ref[...] = jax.nn.sigmoid(h3).astype(o_ref.dtype)


def _choose_tb(batch):
    # Prefer 256-row tiles (v6e/v7x MXU tile); small batches round up to a multiple
    # of 16 (bf16 sublane packing).  Stays well inside v7x's 32 MiB scoped VMEM:
    # resident bf16 weights ~1.3 MiB + 2x double-buffered (256,1024) bf16 x tiles ~1 MiB.
    if batch >= 256:
        return 256
    return max(16, ((batch + 15) // 16) * 16)


def discriminator_forward(img, params):
    """img: (B, C, H, W) float32. Returns (B, 1) float32 validity scores."""
    B = img.shape[0]
    x_flat = img.reshape(B, -1)                      # == img.view(B, -1)
    D = x_flat.shape[1]
    w1, b1, w2, b2, w3, b3 = params

    # bf16 weight/activation inputs to the MXU, f32 accumulation & biases.
    x_bf = x_flat.astype(jnp.bfloat16)
    w1_bf = w1.astype(jnp.bfloat16)
    w2_bf = w2.astype(jnp.bfloat16)
    # Pad the (256, 1) final layer to (256, 128) lanes (zeros beyond column 0).
    w3_pad = jnp.zeros((w3.shape[0], N_PAD), jnp.float32).at[:, :1].set(w3)
    w3_bf = w3_pad.astype(jnp.bfloat16)
    b3_pad = jnp.zeros((1, N_PAD), jnp.float32).at[:, :1].set(b3)

    TB = _choose_tb(B)
    B_pad = pl.cdiv(B, TB) * TB
    if B_pad != B:
        x_bf = jnp.pad(x_bf, ((0, B_pad - B), (0, 0)))

    out = pl.pallas_call(
        discriminator_kernel,
        out_shape=jax.ShapeDtypeStruct((B_pad, N_PAD), jnp.float32),
        grid=(B_pad // TB,),
        in_specs=[
            pl.BlockSpec((TB, D), lambda i: (i, 0)),        # x tile (pipelined)
            pl.BlockSpec((D, 512), lambda i: (0, 0)),       # w1 (resident)
            pl.BlockSpec((1, 512), lambda i: (0, 0)),       # b1
            pl.BlockSpec((512, 256), lambda i: (0, 0)),     # w2
            pl.BlockSpec((1, 256), lambda i: (0, 0)),       # b2
            pl.BlockSpec((256, N_PAD), lambda i: (0, 0)),   # w3 (lane-padded)
            pl.BlockSpec((1, N_PAD), lambda i: (0, 0)),     # b3 (lane-padded)
        ],
        out_specs=pl.BlockSpec((TB, N_PAD), lambda i: (i, 0)),
        compiler_params=pltpu.CompilerParams(
            dimension_semantics=("parallel",),              # megacore shard on v7x
        ),
    )(x_bf, w1_bf, b1, w2_bf, b2, w3_bf, b3_pad)

    return out[:B, :1]


def _reference_forward(img, params):
    """Pure-JAX f32 reference matching the PyTorch module."""
    B = img.shape[0]
    x = img.reshape(B, -1)
    w1, b1, w2, b2, w3, b3 = params
    h1 = _leaky_relu(x @ w1 + b1)
    h2 = _leaky_relu(h1 @ w2 + b2)
    return jax.nn.sigmoid(h2 @ w3 + b3)


def init_params(key, in_features):
    """Deterministic init mimicking PyTorch nn.Linear default: U(-1/sqrt(fan_in), 1/sqrt(fan_in))."""
    dims = [(in_features, 512), (512, 256), (256, 1)]
    params = []
    for fan_in, fan_out in dims:
        kw, kb, key = jax.random.split(key, 3)
        bound = 1.0 / np.sqrt(fan_in)
        w = jax.random.uniform(kw, (fan_in, fan_out), jnp.float32, -bound, bound)
        b = jax.random.uniform(kb, (1, fan_out), jnp.float32, -bound, bound)
        params.extend([w, b])
    return tuple(params)


if __name__ == "__main__":
    # Small, module-consistent shapes: batch=2, channels=4, img_size=16 -> D = 1024.
    B, C, H, W = 2, 4, 16, 16
    D = C * H * W

    key = jax.random.PRNGKey(0)
    k_img, k_par = jax.random.split(key)

    img = jax.random.normal(k_img, (B, C, H, W), jnp.float32)
    params = init_params(k_par, D)

    validity = discriminator_forward(img, params)
    jax.block_until_ready(validity)

    assert validity.shape == (B, 1)
    assert bool(jnp.all((validity >= 0.0) & (validity <= 1.0)))

    # Compare against pure-JAX f32 reference (loose tolerance: bf16 MXU inputs).
    ref = _reference_forward(img, params)
    np.testing.assert_allclose(np.asarray(validity), np.asarray(ref), atol=5e-2, rtol=0)

    print("KERNEL_OK")
</pallas_src>

<mosaic_0001>
module attributes {stable_mosaic.version = 11 : i64} {
  func.func @discriminator_kernel(%arg0: i32, %arg1: memref<16x1024xbf16, #tpu.memory_space<vmem>>, %arg2: memref<1024x512xbf16, #tpu.memory_space<vmem>>, %arg3: memref<1x512xf32, #tpu.memory_space<vmem>>, %arg4: memref<512x256xbf16, #tpu.memory_space<vmem>>, %arg5: memref<1x256xf32, #tpu.memory_space<vmem>>, %arg6: memref<256x128xbf16, #tpu.memory_space<vmem>>, %arg7: memref<1x128xf32, #tpu.memory_space<vmem>>, %arg8: memref<16x128xf32, #tpu.memory_space<vmem>>) attributes {dimension_semantics = [#tpu.dimension_semantics<parallel>], iteration_bounds = array<i64: 1>, scalar_prefetch = 0 : i64, scratch_operands = 0 : i64, tpu.core_type = #tpu.core_type<tc>, window_params = [{transform_indices = @transform_0, window_bounds = array<i64: 16, 1024>}, {pipeline_mode = #tpu.pipeline_mode<synchronous>, transform_indices = @transform_1, window_bounds = array<i64: 1024, 512>}, {pipeline_mode = #tpu.pipeline_mode<synchronous>, transform_indices = @transform_2, window_bounds = array<i64: 1, 512>}, {pipeline_mode = #tpu.pipeline_mode<synchronous>, transform_indices = @transform_3, window_bounds = array<i64: 512, 256>}, {pipeline_mode = #tpu.pipeline_mode<synchronous>, transform_indices = @transform_4, window_bounds = array<i64: 1, 256>}, {pipeline_mode = #tpu.pipeline_mode<synchronous>, transform_indices = @transform_5, window_bounds = array<i64: 256, 128>}, {pipeline_mode = #tpu.pipeline_mode<synchronous>, transform_indices = @transform_6, window_bounds = array<i64: 1, 128>}, {transform_indices = @transform_7, window_bounds = array<i64: 16, 128>}]} {
    %c0 = arith.constant 0 : index
    %c0_0 = arith.constant 0 : index
    %0 = vector.load %arg1[%c0, %c0_0] : memref<16x1024xbf16, #tpu.memory_space<vmem>>, vector<16x1024xbf16>
    %c0_1 = arith.constant 0 : index
    %c0_2 = arith.constant 0 : index
    %1 = vector.load %arg2[%c0_1, %c0_2] : memref<1024x512xbf16, #tpu.memory_space<vmem>>, vector<1024x512xbf16>
    %cst = arith.constant dense<0.000000e+00> : vector<16x512xf32>
    %2 = tpu.matmul %0, %1, %cst {dimension_numbers = #tpu.dot_dimension_numbers<[1], [0], [0], [1], [0, 0, 1, 1], [], []>} : vector<16x1024xbf16>, vector<1024x512xbf16>, vector<16x512xf32> -> vector<16x512xf32>
    %c0_3 = arith.constant 0 : index
    %c0_4 = arith.constant 0 : index
    %3 = vector.load %arg3[%c0_3, %c0_4] : memref<1x512xf32, #tpu.memory_space<vmem>>, vector<1x512xf32>
    %4 = vector.broadcast %3 : vector<1x512xf32> to vector<16x512xf32>
    %5 = arith.addf %2, %4 : vector<16x512xf32>
    %cst_5 = arith.constant 0.000000e+00 : f32
    %6 = vector.broadcast %cst_5 : f32 to vector<16x512xf32>
    %7 = arith.cmpf oge, %5, %6 : vector<16x512xf32>
    %cst_6 = arith.constant 2.000000e-01 : f32
    %8 = vector.broadcast %cst_6 : f32 to vector<16x512xf32>
    %9 = arith.mulf %8, %5 : vector<16x512xf32>
    %10 = arith.select %7, %5, %9 : vector<16x512xi1>, vector<16x512xf32>
    %11 = arith.truncf %10 : vector<16x512xf32> to vector<16x512xbf16>
    %c0_7 = arith.constant 0 : index
    %c0_8 = arith.constant 0 : index
    %12 = vector.load %arg4[%c0_7, %c0_8] : memref<512x256xbf16, #tpu.memory_space<vmem>>, vector<512x256xbf16>
    %cst_9 = arith.constant dense<0.000000e+00> : vector<16x256xf32>
    %13 = tpu.matmul %11, %12, %cst_9 {dimension_numbers = #tpu.dot_dimension_numbers<[1], [0], [0], [1], [0, 0, 1, 1], [], []>} : vector<16x512xbf16>, vector<512x256xbf16>, vector<16x256xf32> -> vector<16x256xf32>
    %c0_10 = arith.constant 0 : index
    %c0_11 = arith.constant 0 : index
    %14 = vector.load %arg5[%c0_10, %c0_11] : memref<1x256xf32, #tpu.memory_space<vmem>>, vector<1x256xf32>
    %15 = vector.broadcast %14 : vector<1x256xf32> to vector<16x256xf32>
    %16 = arith.addf %13, %15 : vector<16x256xf32>
    %cst_12 = arith.constant 0.000000e+00 : f32
    %17 = vector.broadcast %cst_12 : f32 to vector<16x256xf32>
    %18 = arith.cmpf oge, %16, %17 : vector<16x256xf32>
    %cst_13 = arith.constant 2.000000e-01 : f32
    %19 = vector.broadcast %cst_13 : f32 to vector<16x256xf32>
    %20 = arith.mulf %19, %16 : vector<16x256xf32>
    %21 = arith.select %18, %16, %20 : vector<16x256xi1>, vector<16x256xf32>
    %22 = arith.truncf %21 : vector<16x256xf32> to vector<16x256xbf16>
    %c0_14 = arith.constant 0 : index
    %c0_15 = arith.constant 0 : index
    %23 = vector.load %arg6[%c0_14, %c0_15] : memref<256x128xbf16, #tpu.memory_space<vmem>>, vector<256x128xbf16>
    %cst_16 = arith.constant dense<0.000000e+00> : vector<16x128xf32>
    %24 = tpu.matmul %22, %23, %cst_16 {dimension_numbers = #tpu.dot_dimension_numbers<[1], [0], [0], [1], [0, 0, 1, 1], [], []>} : vector<16x256xbf16>, vector<256x128xbf16>, vector<16x128xf32> -> vector<16x128xf32>
    %c0_17 = arith.constant 0 : index
    %c0_18 = arith.constant 0 : index
    %25 = vector.load %arg7[%c0_17, %c0_18] : memref<1x128xf32, #tpu.memory_space<vmem>>, vector<1x128xf32>
    %26 = vector.broadcast %25 : vector<1x128xf32> to vector<16x128xf32>
    %27 = arith.addf %24, %26 : vector<16x128xf32>
    %28 = arith.negf %27 : vector<16x128xf32>
    %29 = math.exp %28 : vector<16x128xf32>
    %cst_19 = arith.constant 1.000000e+00 : f32
    %30 = vector.broadcast %cst_19 : f32 to vector<16x128xf32>
    %31 = arith.addf %30, %29 : vector<16x128xf32>
    %32 = arith.divf %30, %31 : vector<16x128xf32>
    %c0_20 = arith.constant 0 : index
    %c0_21 = arith.constant 0 : index
    %33 = vector.load %arg8[%c0_20, %c0_21] : memref<16x128xf32, #tpu.memory_space<vmem>>, vector<16x128xf32>
    tpu.vector_store %arg8[%c0_20, %c0_21], %32 {strides = array<i32>} : memref<16x128xf32, #tpu.memory_space<vmem>>, vector<16x128xf32>,
    return
  }
  func.func @transform_0(%arg0: i32) -> (i32, i32) {
    %c0_i32 = arith.constant 0 : i32
    %c0_i32_0 = arith.constant 0 : i32
    return %arg0, %c0_i32 : i32, i32
  }
  func.func @transform_1(%arg0: i32) -> (i32, i32) {
    %c0_i32 = arith.constant 0 : i32
    %c0_i32_0 = arith.constant 0 : i32
    %c0_i32_1 = arith.constant 0 : i32
    return %c0_i32, %c0_i32_0 : i32, i32
  }
  func.func @transform_2(%arg0: i32) -> (i32, i32) {
    %c0_i32 = arith.constant 0 : i32
    %c0_i32_0 = arith.constant 0 : i32
    %c0_i32_1 = arith.constant 0 : i32
    return %c0_i32, %c0_i32_0 : i32, i32
  }
  func.func @transform_3(%arg0: i32) -> (i32, i32) {
    %c0_i32 = arith.constant 0 : i32
    %c0_i32_0 = arith.constant 0 : i32
    %c0_i32_1 = arith.constant 0 : i32
    return %c0_i32, %c0_i32_0 : i32, i32
  }
  func.func @transform_4(%arg0: i32) -> (i32, i32) {
    %c0_i32 = arith.constant 0 : i32
    %c0_i32_0 = arith.constant 0 : i32
    %c0_i32_1 = arith.constant 0 : i32
    return %c0_i32, %c0_i32_0 : i32, i32
  }
  func.func @transform_5(%arg0: i32) -> (i32, i32) {
    %c0_i32 = arith.constant 0 : i32
    %c0_i32_0 = arith.constant 0 : i32
    %c0_i32_1 = arith.constant 0 : i32
    return %c0_i32, %c0_i32_0 : i32, i32
  }
  func.func @transform_6(%arg0: i32) -> (i32, i32) {
    %c0_i32 = arith.constant 0 : i32
    %c0_i32_0 = arith.constant 0 : i32
    %c0_i32_1 = arith.constant 0 : i32
    return %c0_i32, %c0_i32_0 : i32, i32
  }
  func.func @transform_7(%arg0: i32) -> (i32, i32) {
    %c0_i32 = arith.constant 0 : i32
    %c0_i32_0 = arith.constant 0 : i32
    return %arg0, %c0_i32 : i32, i32
  }
}

</mosaic_0001>

<bundles_post_ra>
// kernel: tpu_custom_call.1
= control target key start
LH: loop header
LB: loop body
LE: loop exit
PB: predicated region body
PF: predicated region fallthrough
CT: control target
= control target key end

     0   :  { %12 = vsyncpa [#allocation3], 0  ;;  %s5003_s0 = inlined_call_operand.hbm [shape: bf16[16,1024], index: 0, kind: input, shape index: {}]   ;;  %s5004_s1 = inlined_call_operand.hbm [shape: bf16[1024,512], index: 1, kind: input, shape index: {}]   ;;  %s5005_s2 = inlined_call_operand.hbm [shape: f32[1,512], index: 2, kind: input, shape index: {}]   ;;  %s5006_s3 = inlined_call_operand.hbm [shape: bf16[512,256], index: 3, kind: input, shape index: {}]   ;;  %s5007_s4 = inlined_call_operand.vmem [shape: f32[1,256], index: 4, kind: input, shape index: {}]   ;;  %s5008_s5 = inlined_call_operand.hbm [shape: bf16[256,128], index: 5, kind: input, shape index: {}]   ;;  %s5009_s6 = inlined_call_operand.vmem [shape: f32[1,128], index: 6, kind: input, shape index: {}]   ;;  %s5010_s7 = inlined_call_operand.hbm [shape: f32[16,128], index: 7, kind: output, shape index: {}]  }
   0x1   :  { %13 = vsyncpa [#allocation6], 0 }
   0x2   :  { %14 = vsyncpa [#allocation9], 0  ;;  %s33_s26 = sshll.u32 %s5004_s1, 4  ;;  %s34_s26 = int_to_ptr.hbm [resolvable:$true] %s33_s26 }
   0x3   :  { %15 = vsyncpa [#allocation4], 0  ;;  %s4807_s27 = smov [#allocation5]   ;;  %s57_s8 = sshll.u32 %s5006_s3, 4  ;;  %s58_s8 = int_to_ptr.hbm [resolvable:$true] %s57_s8 }
   0x4   :  { %s35_s28 = sshll.u32 %s4807_s27, 4  ;;  %s4808_s9 = smov 256   ;;  %s36_s28 = int_to_ptr.vmem [resolvable:$true] %s35_s28 }
   0x5   :  { %s4809_s10 = smov 16   ;;  %s4810_s11 = smov [#allocation8]  }
   0x6   :  { %41 = dma.hbm_to_vmem [thread:$0]  %s34_s26, 32768, %s36_s28, [#allocation6], %s4808_s9, %s4808_s9, %s4809_s10  }
   0x7   :  { %s59_s12 = sshll.u32 %s4810_s11, 4  ;;  %s4811_s13 = smov 128   ;;  %s60_s12 = int_to_ptr.vmem [resolvable:$true] %s59_s12 }
   0x8   :  { %s4812_s14 = smov 8   ;;  %s20_s16 = sshll.u32 %s5003_s0, 4  ;;  %s21_s16 = int_to_ptr.hbm [resolvable:$true] %s20_s16 }
   0x9   :  { %65 = dma.hbm_to_vmem [thread:$0]  %s58_s8, 8192, %s60_s12, [#allocation9], %s4811_s13, %s4811_s13, %s4812_s14  }
   0xa   :  { %s4813_s17 = smov [#allocation2]   ;;  %s47_s20 = sshll.u32 %s5005_s2, 4  ;;  %s48_s20 = int_to_ptr.hbm [resolvable:$true] %s47_s20 }
   0xb   :  { %s22_s3 = sshll.u32 %s4813_s17, 4  ;;  %s4814_s21 = smov 512   ;;  %s23_s3 = int_to_ptr.vmem [resolvable:$true] %s22_s3 }
   0xc   :  { %s4815_s22 = smov 32   ;;  %s4816_s23 = smov [#allocation7]  }
   0xd   :  { %28 = dma.hbm_to_vmem [thread:$0]  %s21_s16, 1024, %s23_s3, [#allocation3], %s4814_s21, %s4814_s21, %s4815_s22  }
   0xe   :  { %s49_s24 = sshll.u32 %s4816_s23, 4  ;;  %s72_s27 = sshll.u32 %s5008_s5, 4  ;;  %s50_s24 = int_to_ptr.vmem [resolvable:$true] %s49_s24  ;;  %s73_s27 = int_to_ptr.hbm [resolvable:$true] %s72_s27 }
   0xf   :  { %52 = dma.hbm_to_vmem [thread:$0]  %s48_s20, 64, %s50_s24, [#allocation6]  }
  0x10   :  { %s4817_s0 = smov [#allocation10]   ;;  %s4818_s29 = smov 64  }
  0x11   :  { %s74_s28 = sshll.u32 %s4817_s0, 4  ;;  %s4819_s30 = smov 4   ;;  %s75_s28 = int_to_ptr.vmem [resolvable:$true] %s74_s28 }
  0x12   :  { %80 = dma.hbm_to_vmem [thread:$0]  %s73_s27, 2048, %s75_s28, [#allocation9], %s4818_s29, %s4818_s29, %s4819_s30  }
  0x13   :  { %4799 = dma.done.wait [#allocation3], 1024  }
  0x14   :  { %4800 = vsyncadd [#allocation3], 4294966272 }
  0x15   :  { %4801 = dma.done.wait [#allocation6], 32832  }
  0x16   :  { %4802 = vsyncadd [#allocation6], 4294934464 }
  0x17   :  { %4803 = dma.done.wait [#allocation9], 10240  }
  0x18   :  { %4804 = vsyncadd [#allocation9], 4294957056  ;;  %v3056_v0 = vld [vmem:[#allocation5 + $0xe0] sm:$0xf]  ;;  %v4326_v1 = vld [vmem:[#allocation5 + $0xec] sm:$0xf0] }
  0x19   :  { %v3184_v2 = vld [vmem:[#allocation5 + $0x1e0] sm:$0xf]  ;;  %v3057_v3 = vor.u32 %v4326_v1, %v3056_v0  ;;  %v4358_v4 = vld [vmem:[#allocation5 + $0x1ec] sm:$0xf0]  ;;  %s2895_s12 = sshll.u32 %s5010_s7, 4  ;;  %s2896_s12 = int_to_ptr.hbm [resolvable:$true] %s2895_s12 }
  0x1a   :  { %v3312_v5 = vld [vmem:[#allocation5 + $0x2e0] sm:$0xf]  ;;  %v4390_v6 = vld [vmem:[#allocation5 + $0x2ec] sm:$0xf0]  ;;  %v3185_v7 = vor.u32 %v4358_v4, %v3184_v2 }
  0x1b   :  { %v3313_v8 = vor.u32 %v4390_v6, %v3312_v5  ;;  %v3440_v9 = vld [vmem:[#allocation5 + $0x3e0] sm:$0xf]  ;;  %v4422_v10 = vld [vmem:[#allocation5 + $0x3ec] sm:$0xf0]  ;;  %1697 = vmatpush.bf16.msra.mxu0 %v3057_v3 }
  0x1c   :  { %v3040_v11 = vld [vmem:[#allocation5 + $0xc0] sm:$0xf]  ;;  %v3441_v12 = vor.u32 %v4422_v10, %v3440_v9  ;;  %v4322_v13 = vld [vmem:[#allocation5 + $0xcc] sm:$0xf0]  ;;  %1711 = vmatpush.bf16.msra.mxu1 %v3185_v7 }
  0x1d   :  { %v3168_v14 = vld [vmem:[#allocation5 + $0x1c0] sm:$0xf]  ;;  %v4354_v15 = vld [vmem:[#allocation5 + $0x1cc] sm:$0xf0]  ;;  %1725 = vmatpush.bf16.msra.mxu2 %v3313_v8  ;;  %v3041_v16 = vor.u32 %v4322_v13, %v3040_v11 }
  0x1e   :  { %v3169_v17 = vor.u32 %v4354_v15, %v3168_v14  ;;  %v3296_v18 = vld [vmem:[#allocation5 + $0x2c0] sm:$0xf]  ;;  %v4386_v19 = vld [vmem:[#allocation5 + $0x2cc] sm:$0xf0]  ;;  %1739 = vmatpush.bf16.msra.mxu3 %v3441_v12 }
  0x1f   :  { %v3424_v20 = vld [vmem:[#allocation5 + $0x3c0] sm:$0xf]  ;;  %v3297_v21 = vor.u32 %v4386_v19, %v3296_v18  ;;  %v4418_v22 = vld [vmem:[#allocation5 + $0x3cc] sm:$0xf0]  ;;  %1698 = vmatpush.bf16.msra.mxu0 %v3041_v16 }
  0x20   :  { %v3024_v23 = vld [vmem:[#allocation5 + $0xa0] sm:$0xf]  ;;  %v4318_v24 = vld [vmem:[#allocation5 + $0xac] sm:$0xf0]  ;;  %v3425_v25 = vor.u32 %v4418_v22, %v3424_v20  ;;  %1712 = vmatpush.bf16.msra.mxu1 %v3169_v17 }
  0x21   :  { %v3152_v26 = vld [vmem:[#allocation5 + $0x1a0] sm:$0xf]  ;;  %v4350_v27 = vld [vmem:[#allocation5 + $0x1ac] sm:$0xf0]  ;;  %v3025_v29 = vor.u32 %v4318_v24, %v3024_v23  ;;  %1726 = vmatpush.bf16.msra.mxu2 %v3297_v21 }
  0x22   :  { %v3280_v28 = vld [vmem:[#allocation5 + $0x2a0] sm:$0xf]  ;;  %v4382_v30 = vld [vmem:[#allocation5 + $0x2ac] sm:$0xf0]  ;;  %v3153_v33 = vor.u32 %v4350_v27, %v3152_v26  ;;  %1740 = vmatpush.bf16.msra.mxu3 %v3425_v25 }
  0x23   :  { %v3408_v31 = vld [vmem:[#allocation5 + $0x3a0] sm:$0xf]  ;;  %v4414_v32 = vld [vmem:[#allocation5 + $0x3ac] sm:$0xf0]  ;;  %v3281_v34 = vor.u32 %v4382_v30, %v3280_v28  ;;  %1699 = vmatpush.bf16.msra.mxu0 %v3025_v29 }
  0x24   :  { %v3008_v35 = vld [vmem:[#allocation5 + $0x80] sm:$0xf]  ;;  %v4314_v36 = vld [vmem:[#allocation5 + $0x8c] sm:$0xf0]  ;;  %v3409_v38 = vor.u32 %v4414_v32, %v3408_v31  ;;  %1713 = vmatpush.bf16.msra.mxu1 %v3153_v33 }
  0x25   :  { %v3136_v37 = vld [vmem:[#allocation5 + $0x180] sm:$0xf]  ;;  %v4346_v39 = vld [vmem:[#allocation5 + $0x18c] sm:$0xf0]  ;;  %v3009_v44 = vor.u32 %v4314_v36, %v3008_v35  ;;  %1727 = vmatpush.bf16.msra.mxu2 %v3281_v34 }
  0x26   :  { %v3264_v40 = vld [vmem:[#allocation5 + $0x280] sm:$0xf]  ;;  %v4378_v41 = vld [vmem:[#allocation5 + $0x28c] sm:$0xf0]  ;;  %v3137_v45 = vor.u32 %v4346_v39, %v3136_v37  ;;  %1741 = vmatpush.bf16.msra.mxu3 %v3409_v38 }
  0x27   :  { %v3392_v42 = vld [vmem:[#allocation5 + $0x380] sm:$0xf]  ;;  %v4410_v43 = vld [vmem:[#allocation5 + $0x38c] sm:$0xf0]  ;;  %v3265_v46 = vor.u32 %v4378_v41, %v3264_v40  ;;  %1700 = vmatpush.bf16.msra.mxu0 %v3009_v44 }
  0x28   :  { %v2992_v47 = vld [vmem:[#allocation5 + $0x60] sm:$0xf]  ;;  %v4310_v48 = vld [vmem:[#allocation5 + $0x6c] sm:$0xf0]  ;;  %v3393_v50 = vor.u32 %v4410_v43, %v3392_v42  ;;  %1714 = vmatpush.bf16.msra.mxu1 %v3137_v45 }
  0x29   :  { %v3120_v49 = vld [vmem:[#allocation5 + $0x160] sm:$0xf]  ;;  %v4342_v51 = vld [vmem:[#allocation5 + $0x16c] sm:$0xf0]  ;;  %v2993_v56 = vor.u32 %v4310_v48, %v2992_v47  ;;  %1728 = vmatpush.bf16.msra.mxu2 %v3265_v46 }
  0x2a   :  { %v3248_v52 = vld [vmem:[#allocation5 + $0x260] sm:$0xf]  ;;  %v4374_v53 = vld [vmem:[#allocation5 + $0x26c] sm:$0xf0]  ;;  %v3121_v57 = vor.u32 %v4342_v51, %v3120_v49  ;;  %1742 = vmatpush.bf16.msra.mxu3 %v3393_v50 }
  0x2b   :  { %v3376_v54 = vld [vmem:[#allocation5 + $0x360] sm:$0xf]  ;;  %v4406_v55 = vld [vmem:[#allocation5 + $0x36c] sm:$0xf0]  ;;  %v3249_v58 = vor.u32 %v4374_v53, %v3248_v52  ;;  %1701 = vmatpush.bf16.msra.mxu0 %v2993_v56 }
  0x2c   :  { %v2976_v59 = vld [vmem:[#allocation5 + $0x40] sm:$0xf]  ;;  %v4306_v60 = vld [vmem:[#allocation5 + $0x4c] sm:$0xf0]  ;;  %v3377_v62 = vor.u32 %v4406_v55, %v3376_v54  ;;  %1715 = vmatpush.bf16.msra.mxu1 %v3121_v57  ;;  %v2920_v54 = vld [vmem:[#allocation2 + $0x8] sm:$0xf] }
  0x2d   :  { %v3104_v61 = vld [vmem:[#allocation5 + $0x140] sm:$0xf]  ;;  %v4338_v63 = vld [vmem:[#allocation5 + $0x14c] sm:$0xf0]  ;;  %v2977_v4 = vor.u32 %v4306_v60, %v2976_v59  ;;  %1729 = vmatpush.bf16.msra.mxu2 %v3249_v58  ;;  %v4293_v59 = vld [vmem:[#allocation2 + $0x24] sm:$0xf0] }
  0x2e   :  { %v3232_v0 = vld [vmem:[#allocation5 + $0x240] sm:$0xf]  ;;  %v4370_v1 = vld [vmem:[#allocation5 + $0x24c] sm:$0xf0]  ;;  %v3105_v5 = vor.u32 %v4338_v63, %v3104_v61  ;;  %1743 = vmatpush.bf16.msra.mxu3 %v3377_v62 }
  0x2f   :  { %v3360_v2 = vld [vmem:[#allocation5 + $0x340] sm:$0xf]  ;;  %v4402_v3 = vld [vmem:[#allocation5 + $0x34c] sm:$0xf0]  ;;  %v3233_v6 = vor.u32 %v4370_v1, %v3232_v0  ;;  %1702 = vmatpush.bf16.msra.mxu0 %v2977_v4  ;;  %v4881_v1 = vor.u32 %v4293_v59, %v2920_v54 }
  0x30   :  { %v2960_v7 = vld [vmem:[#allocation5 + $0x20] sm:$0xf]  ;;  %v4302_v8 = vld [vmem:[#allocation5 + $0x2c] sm:$0xf0]  ;;  %v3361_v10 = vor.u32 %v4402_v3, %v3360_v2  ;;  %1716 = vmatpush.bf16.msra.mxu1 %v3105_v5 }
  0x31   :  { %v3088_v9 = vld [vmem:[#allocation5 + $0x120] sm:$0xf]  ;;  %v4334_v11 = vld [vmem:[#allocation5 + $0x12c] sm:$0xf0]  ;;  %v2961_v16 = vor.u32 %v4302_v8, %v2960_v7  ;;  %1730 = vmatpush.bf16.msra.mxu2 %v3233_v6  ;;  %v4288_v6 = vld [vmem:[#allocation2 + $0x4] sm:$0xf] }
  0x32   :  { %v3216_v12 = vld [vmem:[#allocation5 + $0x220] sm:$0xf]  ;;  %v4366_v13 = vld [vmem:[#allocation5 + $0x22c] sm:$0xf0]  ;;  %v3089_v19 = vor.u32 %v4334_v11, %v3088_v9  ;;  %1744 = vmatpush.bf16.msra.mxu3 %v3361_v10  ;;  %v2914_v7 = vld [vmem:[#allocation2 + $0x20] sm:$0xf0] }
  0x33   :  { %v3344_v14 = vld [vmem:[#allocation5 + $0x320] sm:$0xf]  ;;  %v4398_v15 = vld [vmem:[#allocation5 + $0x32c] sm:$0xf0]  ;;  %v3217_v20 = vor.u32 %v4366_v13, %v3216_v12  ;;  %1703 = vmatpush.bf16.msra.mxu0 %v2961_v16  ;;  %v4289_v8 = vld [vmem:[#allocation2 + $0xc] sm:$0xf]  ;;  %v4885_v10 = vor.u32 %v4288_v6, %v2914_v7 }
  0x34   :  { %v2944_v17 = vld [vmem:[#allocation5] sm:$0xf]  ;;  %v4298_v18 = vld [vmem:[#allocation5 + $0xc] sm:$0xf0]  ;;  %v3345_v24 = vor.u32 %v4398_v15, %v3344_v14  ;;  %1717 = vmatpush.bf16.msra.mxu1 %v3089_v19  ;;  %v2922_v11 = vld [vmem:[#allocation2 + $0x28] sm:$0xf0] }
  0x35   :  { %v3072_v21 = vld [vmem:[#allocation5 + $0x100] sm:$0xf]  ;;  %v4330_v22 = vld [vmem:[#allocation5 + $0x10c] sm:$0xf0]  ;;  %v2945_v31 = vor.u32 %v4298_v18, %v2944_v17  ;;  %1731 = vmatpush.bf16.msra.mxu2 %v3217_v20  ;;  %v4887_v17 = vor.u32 %v4289_v8, %v2922_v11 }
  0x36   :  { %v3200_v23 = vld [vmem:[#allocation5 + $0x200] sm:$0xf]  ;;  %v4362_v25 = vld [vmem:[#allocation5 + $0x20c] sm:$0xf0]  ;;  %v3073_v35 = vor.u32 %v4330_v22, %v3072_v21  ;;  %1745 = vmatpush.bf16.msra.mxu3 %v3345_v24 }
  0x37   :  { %v3328_v26 = vld [vmem:[#allocation5 + $0x300] sm:$0xf]  ;;  %v4394_v27 = vld [vmem:[#allocation5 + $0x30c] sm:$0xf0]  ;;  %v3201_v36 = vor.u32 %v4362_v25, %v3200_v23  ;;  %1704 = vmatpush.bf16.msra.mxu0 %v2945_v31 }
  0x38   :  { %v3568_v28 = vld [vmem:[#allocation5 + $0x4e0] sm:$0xf]  ;;  %v4454_v29 = vld [vmem:[#allocation5 + $0x4ec] sm:$0xf0]  ;;  %v3329_v39 = vor.u32 %v4394_v27, %v3328_v26  ;;  %1718 = vmatpush.bf16.msra.mxu1 %v3073_v35 }
  0x39   :  { %v3696_v30 = vld [vmem:[#allocation5 + $0x5e0] sm:$0xf]  ;;  %v4486_v32 = vld [vmem:[#allocation5 + $0x5ec] sm:$0xf0]  ;;  %v3569_v40 = vor.u32 %v4454_v29, %v3568_v28  ;;  %1732 = vmatpush.bf16.msra.mxu2 %v3201_v36 }
  0x3a   :  { %v3824_v33 = vld [vmem:[#allocation5 + $0x6e0] sm:$0xf]  ;;  %v4518_v34 = vld [vmem:[#allocation5 + $0x6ec] sm:$0xf0]  ;;  %v3697_v43 = vor.u32 %v4486_v32, %v3696_v30  ;;  %1746 = vmatpush.bf16.msra.mxu3 %v3329_v39 }
  0x3b   :  { %v3952_v37 = vld [vmem:[#allocation5 + $0x7e0] sm:$0xf]  ;;  %v4550_v38 = vld [vmem:[#allocation5 + $0x7ec] sm:$0xf0]  ;;  %v3825_v44 = vor.u32 %v4518_v34, %v3824_v33  ;;  %1753 = vmatpush.bf16.msrb.mxu0 %v3569_v40  ;;  %1719 = vmatmul.bf16.vlgmr.msra.gmra.mxu1 %v4885_v10 }
  0x3c   :  { %v3552_v41 = vld [vmem:[#allocation5 + $0x4c0] sm:$0xf]  ;;  %v4450_v42 = vld [vmem:[#allocation5 + $0x4cc] sm:$0xf0]  ;;  %v3953_v48 = vor.u32 %v4550_v38, %v3952_v37  ;;  %1767 = vmatpush.bf16.msrb.mxu1 %v3697_v43  ;;  %1733 = vmatmul.bf16.vlgmr.msra.gmra.mxu2 %v4881_v1 }
  0x3d   :  { %v3680_v45 = vld [vmem:[#allocation5 + $0x5c0] sm:$0xf]  ;;  %v4482_v46 = vld [vmem:[#allocation5 + $0x5cc] sm:$0xf0]  ;;  %v3553_v55 = vor.u32 %v4450_v42, %v3552_v41  ;;  %1781 = vmatpush.bf16.msrb.mxu2 %v3825_v44  ;;  %1747 = vmatmul.bf16.vlgmr.msra.gmra.mxu3 %v4887_v17 }
  0x3e   :  { %v3808_v47 = vld [vmem:[#allocation5 + $0x6c0] sm:$0xf]  ;;  %v4514_v49 = vld [vmem:[#allocation5 + $0x6cc] sm:$0xf0]  ;;  %v3681_v60 = vor.u32 %v4482_v46, %v3680_v45  ;;  %1795 = vmatpush.bf16.msrb.mxu3 %v3953_v48 }
  0x3f   :  { %v3936_v50 = vld [vmem:[#allocation5 + $0x7c0] sm:$0xf]  ;;  %v4546_v51 = vld [vmem:[#allocation5 + $0x7cc] sm:$0xf0]  ;;  %v3809_v61 = vor.u32 %v4514_v49, %v3808_v47  ;;  %1754 = vmatpush.bf16.msrb.mxu0 %v3553_v55 }
  0x40   :  { %v2912_v52 = vld [vmem:[#allocation2] sm:$0xf]  ;;  %v4446_v57 = vld [vmem:[#allocation5 + $0x4ac] sm:$0xf0]  ;;  %v3937_v2 = vor.u32 %v4546_v51, %v3936_v50  ;;  %1768 = vmatpush.bf16.msrb.mxu1 %v3681_v60 }
  0x41   :  { %v4292_v53 = vld [vmem:[#allocation2 + $0x1c] sm:$0xf0]  ;;  %v4478_v63 = vld [vmem:[#allocation5 + $0x5ac] sm:$0xf0]  ;;  %1782 = vmatpush.bf16.msrb.mxu2 %v3809_v61 }
  0x42   :  { %v3536_v56 = vld [vmem:[#allocation5 + $0x4a0] sm:$0xf]  ;;  %v4879_v58 = vor.u32 %v4292_v53, %v2912_v52  ;;  %v4510_v3 = vld [vmem:[#allocation5 + $0x6ac] sm:$0xf0]  ;;  %1796 = vmatpush.bf16.msrb.mxu3 %v3937_v2 }
  0x43   :  { %v3664_v62 = vld [vmem:[#allocation5 + $0x5a0] sm:$0xf]  ;;  %v4542_v5 = vld [vmem:[#allocation5 + $0x7ac] sm:$0xf0]  ;;  %v3537_v9 = vor.u32 %v4446_v57, %v3536_v56 }
  0x44   :  { %v3792_v0 = vld [vmem:[#allocation5 + $0x6a0] sm:$0xf]  ;;  %1705 = vmatmul.bf16.vlgmr.msra.gmra.mxu0 %v4879_v58  ;;  %v3665_v12 = vor.u32 %v4478_v63, %v3664_v62  ;;  %v4442_v15 = vld [vmem:[#allocation5 + $0x48c] sm:$0xf0] }
  0x45   :  { %v3920_v4 = vld [vmem:[#allocation5 + $0x7a0] sm:$0xf]  ;;  %v3793_v13 = vor.u32 %v4510_v3, %v3792_v0  ;;  %v4474_v19 = vld [vmem:[#allocation5 + $0x58c] sm:$0xf0]  ;;  %1755 = vmatpush.bf16.msrb.mxu0 %v3537_v9  ;;  %v4324_v9 = vld [vmem:[#allocation5 + $0xe4] sm:$0xf] }
  0x46   :  { %v3520_v14 = vld [vmem:[#allocation5 + $0x480] sm:$0xf]  ;;  %v3921_v18 = vor.u32 %v4542_v5, %v3920_v4  ;;  %v4506_v21 = vld [vmem:[#allocation5 + $0x68c] sm:$0xf0]  ;;  %1769 = vmatpush.bf16.msrb.mxu1 %v3665_v12  ;;  %v3058_v12 = vld [vmem:[#allocation5 + $0xf0] sm:$0xf0] }
  0x47   :  { %v3648_v16 = vld [vmem:[#allocation5 + $0x580] sm:$0xf]  ;;  %v4538_v23 = vld [vmem:[#allocation5 + $0x78c] sm:$0xf0]  ;;  %v3521_v24 = vor.u32 %v4442_v15, %v3520_v14  ;;  %1783 = vmatpush.bf16.msrb.mxu2 %v3793_v13  ;;  %v4356_v13 = vld [vmem:[#allocation5 + $0x1e4] sm:$0xf] }
  0x48   :  { %v3776_v20 = vld [vmem:[#allocation5 + $0x680] sm:$0xf]  ;;  %v3649_v25 = vor.u32 %v4474_v19, %v3648_v16  ;;  %v4438_v28 = vld [vmem:[#allocation5 + $0x46c] sm:$0xf0]  ;;  %1797 = vmatpush.bf16.msrb.mxu3 %v3921_v18  ;;  %v3186_v14 = vld [vmem:[#allocation5 + $0x1f0] sm:$0xf0] }
  0x49   :  { %v3904_v22 = vld [vmem:[#allocation5 + $0x780] sm:$0xf]  ;;  %v3777_v26 = vor.u32 %v4506_v21, %v3776_v20  ;;  %v4470_v31 = vld [vmem:[#allocation5 + $0x56c] sm:$0xf0]  ;;  %1756 = vmatpush.bf16.msrb.mxu0 %v3521_v24  ;;  %v4388_v15 = vld [vmem:[#allocation5 + $0x2e4] sm:$0xf] }
  0x4a   :  { %v3504_v27 = vld [vmem:[#allocation5 + $0x460] sm:$0xf]  ;;  %v3905_v30 = vor.u32 %v4538_v23, %v3904_v22  ;;  %v4502_v33 = vld [vmem:[#allocation5 + $0x66c] sm:$0xf0]  ;;  %1770 = vmatpush.bf16.msrb.mxu1 %v3649_v25  ;;  %v3314_v16 = vld [vmem:[#allocation5 + $0x2f0] sm:$0xf0] }
  0x4b   :  { %v3632_v29 = vld [vmem:[#allocation5 + $0x560] sm:$0xf]  ;;  %v4534_v35 = vld [vmem:[#allocation5 + $0x76c] sm:$0xf0]  ;;  %v3505_v36 = vor.u32 %v4438_v28, %v3504_v27  ;;  %1784 = vmatpush.bf16.msrb.mxu2 %v3777_v26  ;;  %v4420_v18 = vld [vmem:[#allocation5 + $0x3e4] sm:$0xf] }
  0x4c   :  { %v3760_v32 = vld [vmem:[#allocation5 + $0x660] sm:$0xf]  ;;  %v3633_v37 = vor.u32 %v4470_v31, %v3632_v29  ;;  %v4434_v40 = vld [vmem:[#allocation5 + $0x44c] sm:$0xf0]  ;;  %1798 = vmatpush.bf16.msrb.mxu3 %v3905_v30  ;;  %v3442_v20 = vld [vmem:[#allocation5 + $0x3f0] sm:$0xf0]  ;;  %v3061_v29 = vor.u32 %v4324_v9, %v3058_v12 }
  0x4d   :  { %v3888_v34 = vld [vmem:[#allocation5 + $0x760] sm:$0xf]  ;;  %v3761_v38 = vor.u32 %v4502_v33, %v3760_v32  ;;  %v4466_v43 = vld [vmem:[#allocation5 + $0x54c] sm:$0xf0]  ;;  %1757 = vmatpush.bf16.msrb.mxu0 %v3505_v36  ;;  %v2936_v25 = vld [vmem:[#allocation2 + $0x18] sm:$0xf]  ;;  %v3189_v33 = vor.u32 %v4356_v13, %v3186_v14 }
  0x4e   :  { %v3488_v39 = vld [vmem:[#allocation5 + $0x440] sm:$0xf]  ;;  %v3889_v42 = vor.u32 %v4534_v35, %v3888_v34  ;;  %v4498_v45 = vld [vmem:[#allocation5 + $0x64c] sm:$0xf0]  ;;  %1771 = vmatpush.bf16.msrb.mxu1 %v3633_v37  ;;  %v4295_v26 = vld [vmem:[#allocation2 + $0x34] sm:$0xf0]  ;;  %v3317_v34 = vor.u32 %v4388_v15, %v3314_v16 }
  0x4f   :  { %v3616_v41 = vld [vmem:[#allocation5 + $0x540] sm:$0xf]  ;;  %v4530_v47 = vld [vmem:[#allocation5 + $0x74c] sm:$0xf0]  ;;  %v3489_v48 = vor.u32 %v4434_v40, %v3488_v39  ;;  %1785 = vmatpush.bf16.msrb.mxu2 %v3761_v38  ;;  %v4290_v27 = vld [vmem:[#allocation2 + $0x14] sm:$0xf]  ;;  %v3445_v38 = vor.u32 %v4420_v18, %v3442_v20 }
  0x50   :  { %v3744_v44 = vld [vmem:[#allocation5 + $0x640] sm:$0xf]  ;;  %v3617_v50 = vor.u32 %v4466_v43, %v3616_v41  ;;  %v4430_v52 = vld [vmem:[#allocation5 + $0x42c] sm:$0xf0]  ;;  %1799 = vmatpush.bf16.msrb.mxu3 %v3889_v42  ;;  %v2930_v30 = vld [vmem:[#allocation2 + $0x30] sm:$0xf0]  ;;  %v4893_v43 = vor.u32 %v4295_v26, %v2936_v25 }
  0x51   :  { %v3872_v46 = vld [vmem:[#allocation5 + $0x740] sm:$0xf]  ;;  %v3745_v51 = vor.u32 %v4498_v45, %v3744_v44  ;;  %v4462_v54 = vld [vmem:[#allocation5 + $0x52c] sm:$0xf0]  ;;  %1758 = vmatpush.bf16.msrb.mxu0 %v3489_v48  ;;  %v4291_v31 = vld [vmem:[#allocation2 + $0x1c] sm:$0xf]  ;;  %v4895_v44 = vor.u32 %v4290_v27, %v2930_v30 }
  0x52   :  { %v3472_v49 = vld [vmem:[#allocation5 + $0x420] sm:$0xf]  ;;  %v3873_v55 = vor.u32 %v4530_v47, %v3872_v46  ;;  %v4494_v57 = vld [vmem:[#allocation5 + $0x62c] sm:$0xf0]  ;;  %1772 = vmatpush.bf16.msrb.mxu1 %v3617_v50  ;;  %v2938_v32 = vld [vmem:[#allocation2 + $0x38] sm:$0xf0] }
  0x53   :  { %v3600_v53 = vld [vmem:[#allocation5 + $0x520] sm:$0xf]  ;;  %v4526_v60 = vld [vmem:[#allocation5 + $0x72c] sm:$0xf0]  ;;  %v3473_v63 = vor.u32 %v4430_v52, %v3472_v49  ;;  %1786 = vmatpush.bf16.msrb.mxu2 %v3745_v51  ;;  %v4320_v35 = vld [vmem:[#allocation5 + $0xc4] sm:$0xf]  ;;  %v4897_v47 = vor.u32 %v4291_v31, %v2938_v32 }
  0x54   :  { %v3728_v56 = vld [vmem:[#allocation5 + $0x620] sm:$0xf]  ;;  %v4426_v62 = vld [vmem:[#allocation5 + $0x40c] sm:$0xf0]  ;;  %v3601_v5 = vor.u32 %v4462_v54, %v3600_v53  ;;  %1800 = vmatpush.bf16.msrb.mxu3 %v3873_v55  ;;  %v3042_v36 = vld [vmem:[#allocation5 + $0xd0] sm:$0xf0] }
  0x55   :  { %v3856_v59 = vld [vmem:[#allocation5 + $0x720] sm:$0xf]  ;;  %v4458_v2 = vld [vmem:[#allocation5 + $0x50c] sm:$0xf0]  ;;  %v3729_v6 = vor.u32 %v4494_v57, %v3728_v56  ;;  %1759 = vmatpush.bf16.msrb.mxu0 %v3473_v63  ;;  %v4352_v37 = vld [vmem:[#allocation5 + $0x1c4] sm:$0xf]  ;;  %v3045_v48 = vor.u32 %v4320_v35, %v3042_v36 }
  0x56   :  { %v3456_v61 = vld [vmem:[#allocation5 + $0x400] sm:$0xf]  ;;  %v4490_v4 = vld [vmem:[#allocation5 + $0x60c] sm:$0xf0]  ;;  %v3857_v11 = vor.u32 %v4526_v60, %v3856_v59  ;;  %1773 = vmatpush.bf16.msrb.mxu1 %v3601_v5  ;;  %v3170_v40 = vld [vmem:[#allocation5 + $0x1d0] sm:$0xf0] }
  0x57   :  { %v3584_v0 = vld [vmem:[#allocation5 + $0x500] sm:$0xf]  ;;  %v4522_v8 = vld [vmem:[#allocation5 + $0x70c] sm:$0xf0]  ;;  %v3457_v19 = vor.u32 %v4426_v62, %v3456_v61  ;;  %1787 = vmatpush.bf16.msrb.mxu2 %v3729_v6  ;;  %v4384_v41 = vld [vmem:[#allocation5 + $0x2c4] sm:$0xf]  ;;  %v3173_v49 = vor.u32 %v4352_v37, %v3170_v40 }
  0x58   :  { %v3712_v3 = vld [vmem:[#allocation5 + $0x600] sm:$0xf]  ;;  %v2928_v21 = vld [vmem:[#allocation2 + $0x10] sm:$0xf]  ;;  %v3585_v23 = vor.u32 %v4458_v2, %v3584_v0  ;;  %1801 = vmatpush.bf16.msrb.mxu3 %v3857_v11  ;;  %v3298_v42 = vld [vmem:[#allocation5 + $0x2d0] sm:$0xf0] }
  0x59   :  { %v3840_v7 = vld [vmem:[#allocation5 + $0x700] sm:$0xf]  ;;  %v4294_v22 = vld [vmem:[#allocation2 + $0x2c] sm:$0xf0]  ;;  %v3713_v24 = vor.u32 %v4490_v4, %v3712_v3  ;;  %1760 = vmatpush.bf16.msrb.mxu0 %v3457_v19  ;;  %v4416_v45 = vld [vmem:[#allocation5 + $0x3c4] sm:$0xf]  ;;  %v3301_v50 = vor.u32 %v4384_v41, %v3298_v42 }
  0x5a   :  { %v3841_v28 = vor.u32 %v4522_v8, %v3840_v7  ;;  %v4891_v39 = vor.u32 %v4294_v22, %v2928_v21  ;;  %1774 = vmatpush.bf16.msrb.mxu1 %v3585_v23  ;;  %v3426_v46 = vld [vmem:[#allocation5 + $0x3d0] sm:$0xf0]  ;;  %v4316_v51 = vld [vmem:[#allocation5 + $0xa4] sm:$0xf] }
  0x5b   :  { %1788 = vmatpush.bf16.msrb.mxu2 %v3713_v24  ;;  %v3026_v52 = vld [vmem:[#allocation5 + $0xb0] sm:$0xf0]  ;;  %v4348_v53 = vld [vmem:[#allocation5 + $0x1a4] sm:$0xf]  ;;  %v3429_v54 = vor.u32 %v4416_v45, %v3426_v46 }
  0x5c   :  { %1802 = vmatpush.bf16.msrb.mxu3 %v3841_v28  ;;  %1761 = vmatmul.bf16.vlgmr.msrb.gmra.mxu0 %v4891_v39  ;;  %v3154_v55 = vld [vmem:[#allocation5 + $0x1b0] sm:$0xf0]  ;;  %v4380_v56 = vld [vmem:[#allocation5 + $0x2a4] sm:$0xf]  ;;  %v3029_v61 = vor.u32 %v4316_v51, %v3026_v52 }
  0x5d   :  { %1809 = vmatpush.bf16.msra.mxu0 %v3061_v29  ;;  %v3282_v57 = vld [vmem:[#allocation5 + $0x2b0] sm:$0xf0]  ;;  %1775 = vmatmul.bf16.vlgmr.msrb.gmra.mxu1 %v4895_v44  ;;  %v4412_v59 = vld [vmem:[#allocation5 + $0x3a4] sm:$0xf]  ;;  %v3157_v62 = vor.u32 %v4348_v53, %v3154_v55 }
  0x5e   :  { %1823 = vmatpush.bf16.msra.mxu1 %v3189_v33  ;;  %1789 = vmatmul.bf16.vlgmr.msrb.gmra.mxu2 %v4893_v43  ;;  %v3410_v60 = vld [vmem:[#allocation5 + $0x3b0] sm:$0xf0]  ;;  %v3285_v63 = vor.u32 %v4380_v56, %v3282_v57  ;;  %v4312_v0 = vld [vmem:[#allocation5 + $0x84] sm:$0xf] }
  0x5f   :  { %1837 = vmatpush.bf16.msra.mxu2 %v3317_v34  ;;  %1803 = vmatmul.bf16.vlgmr.msrb.gmra.mxu3 %v4897_v47  ;;  %v3010_v2 = vld [vmem:[#allocation5 + $0x90] sm:$0xf0]  ;;  %v4344_v3 = vld [vmem:[#allocation5 + $0x184] sm:$0xf]  ;;  %v3413_v4 = vor.u32 %v4412_v59, %v3410_v60 }
  0x60   :  { %1851 = vmatpush.bf16.msra.mxu3 %v3445_v38  ;;  %v3138_v5 = vld [vmem:[#allocation5 + $0x190] sm:$0xf0]  ;;  %v4376_v6 = vld [vmem:[#allocation5 + $0x284] sm:$0xf]  ;;  %v3013_v11 = vor.u32 %v4312_v0, %v3010_v2 }
  0x61   :  { %1810 = vmatpush.bf16.msra.mxu0 %v3045_v48  ;;  %v3266_v7 = vld [vmem:[#allocation5 + $0x290] sm:$0xf0]  ;;  %v4408_v8 = vld [vmem:[#allocation5 + $0x384] sm:$0xf]  ;;  %v3141_v12 = vor.u32 %v4344_v3, %v3138_v5 }
  0x62   :  { %1824 = vmatpush.bf16.msra.mxu1 %v3173_v49  ;;  %v3394_v9 = vld [vmem:[#allocation5 + $0x390] sm:$0xf0]  ;;  %v3269_v13 = vor.u32 %v4376_v6, %v3266_v7  ;;  %v4308_v14 = vld [vmem:[#allocation5 + $0x64] sm:$0xf] }
  0x63   :  { %1838 = vmatpush.bf16.msra.mxu2 %v3301_v50  ;;  %v2994_v15 = vld [vmem:[#allocation5 + $0x70] sm:$0xf0]  ;;  %v4340_v16 = vld [vmem:[#allocation5 + $0x164] sm:$0xf]  ;;  %v3397_v18 = vor.u32 %v4408_v8, %v3394_v9 }
  0x64   :  { %1852 = vmatpush.bf16.msra.mxu3 %v3429_v54  ;;  %v3122_v19 = vld [vmem:[#allocation5 + $0x170] sm:$0xf0]  ;;  %v4372_v20 = vld [vmem:[#allocation5 + $0x264] sm:$0xf]  ;;  %v2997_v24 = vor.u32 %v4308_v14, %v2994_v15 }
  0x65   :  { %1811 = vmatpush.bf16.msra.mxu0 %v3029_v61  ;;  %v3250_v21 = vld [vmem:[#allocation5 + $0x270] sm:$0xf0]  ;;  %v4404_v22 = vld [vmem:[#allocation5 + $0x364] sm:$0xf]  ;;  %v3125_v25 = vor.u32 %v4340_v16, %v3122_v19 }
  0x66   :  { %1825 = vmatpush.bf16.msra.mxu1 %v3157_v62  ;;  %v3378_v23 = vld [vmem:[#allocation5 + $0x370] sm:$0xf0]  ;;  %v3253_v26 = vor.u32 %v4372_v20, %v3250_v21  ;;  %v4304_v27 = vld [vmem:[#allocation5 + $0x44] sm:$0xf] }
  0x67   :  { %1839 = vmatpush.bf16.msra.mxu2 %v3285_v63  ;;  %v2978_v28 = vld [vmem:[#allocation5 + $0x50] sm:$0xf0]  ;;  %v4336_v29 = vld [vmem:[#allocation5 + $0x144] sm:$0xf]  ;;  %v3381_v30 = vor.u32 %v4404_v22, %v3378_v23 }
  0x68   :  { %1853 = vmatpush.bf16.msra.mxu3 %v3413_v4  ;;  %v3106_v31 = vld [vmem:[#allocation5 + $0x150] sm:$0xf0]  ;;  %v4368_v32 = vld [vmem:[#allocation5 + $0x244] sm:$0xf]  ;;  %v2981_v36 = vor.u32 %v4304_v27, %v2978_v28 }
  0x69   :  { %1812 = vmatpush.bf16.msra.mxu0 %v3013_v11  ;;  %v3234_v33 = vld [vmem:[#allocation5 + $0x250] sm:$0xf0]  ;;  %v4400_v34 = vld [vmem:[#allocation5 + $0x344] sm:$0xf]  ;;  %v3109_v37 = vor.u32 %v4336_v29, %v3106_v31 }
  0x6a   :  { %1826 = vmatpush.bf16.msra.mxu1 %v3141_v12  ;;  %v3362_v35 = vld [vmem:[#allocation5 + $0x350] sm:$0xf0]  ;;  %v3237_v38 = vor.u32 %v4368_v32, %v3234_v33  ;;  %v4300_v40 = vld [vmem:[#allocation5 + $0x24] sm:$0xf] }
  0x6b   :  { %1840 = vmatpush.bf16.msra.mxu2 %v3269_v13  ;;  %v2962_v41 = vld [vmem:[#allocation5 + $0x30] sm:$0xf0]  ;;  %v4332_v42 = vld [vmem:[#allocation5 + $0x124] sm:$0xf]  ;;  %v3365_v45 = vor.u32 %v4400_v34, %v3362_v35 }
  0x6c   :  { %1854 = vmatpush.bf16.msra.mxu3 %v3397_v18  ;;  %v3090_v46 = vld [vmem:[#allocation5 + $0x130] sm:$0xf0]  ;;  %v4364_v48 = vld [vmem:[#allocation5 + $0x224] sm:$0xf]  ;;  %v2965_v52 = vor.u32 %v4300_v40, %v2962_v41 }
  0x6d   :  { %1813 = vmatpush.bf16.msra.mxu0 %v2997_v24  ;;  %v3218_v49 = vld [vmem:[#allocation5 + $0x230] sm:$0xf0]  ;;  %v4396_v50 = vld [vmem:[#allocation5 + $0x324] sm:$0xf]  ;;  %v3093_v55 = vor.u32 %v4332_v42, %v3090_v46 }
  0x6e   :  { %1827 = vmatpush.bf16.msra.mxu1 %v3125_v25  ;;  %v3346_v51 = vld [vmem:[#allocation5 + $0x330] sm:$0xf0]  ;;  %v4296_v53 = vld [vmem:[#allocation5 + $0x4] sm:$0xf]  ;;  %v3221_v56 = vor.u32 %v4364_v48, %v3218_v49 }
  0x6f   :  { %1841 = vmatpush.bf16.msra.mxu2 %v3253_v26  ;;  %v2946_v54 = vld [vmem:[#allocation5 + $0x10] sm:$0xf0]  ;;  %v4328_v57 = vld [vmem:[#allocation5 + $0x104] sm:$0xf]  ;;  %v3349_v61 = vor.u32 %v4396_v50, %v3346_v51 }
  0x70   :  { %1855 = vmatpush.bf16.msra.mxu3 %v3381_v30  ;;  %v3074_v59 = vld [vmem:[#allocation5 + $0x110] sm:$0xf0]  ;;  %v4360_v60 = vld [vmem:[#allocation5 + $0x204] sm:$0xf]  ;;  %v2949_v5 = vor.u32 %v4296_v53, %v2946_v54 }
  0x71   :  { %1814 = vmatpush.bf16.msra.mxu0 %v2981_v36  ;;  %v3202_v62 = vld [vmem:[#allocation5 + $0x210] sm:$0xf0]  ;;  %v4392_v63 = vld [vmem:[#allocation5 + $0x304] sm:$0xf]  ;;  %v3077_v9 = vor.u32 %v4328_v57, %v3074_v59 }
  0x72   :  { %1828 = vmatpush.bf16.msra.mxu1 %v3109_v37  ;;  %v3330_v0 = vld [vmem:[#allocation5 + $0x310] sm:$0xf0]  ;;  %v4452_v2 = vld [vmem:[#allocation5 + $0x4e4] sm:$0xf]  ;;  %v3205_v11 = vor.u32 %v4360_v60, %v3202_v62 }
  0x73   :  { %1842 = vmatpush.bf16.msra.mxu2 %v3237_v38  ;;  %v3570_v3 = vld [vmem:[#allocation5 + $0x4f0] sm:$0xf0]  ;;  %v4484_v4 = vld [vmem:[#allocation5 + $0x5e4] sm:$0xf]  ;;  %v3333_v14 = vor.u32 %v4392_v63, %v3330_v0 }
  0x74   :  { %1856 = vmatpush.bf16.msra.mxu3 %v3365_v45  ;;  %v3698_v6 = vld [vmem:[#allocation5 + $0x5f0] sm:$0xf0]  ;;  %v4516_v7 = vld [vmem:[#allocation5 + $0x6e4] sm:$0xf]  ;;  %v3573_v15 = vor.u32 %v4452_v2, %v3570_v3 }
  0x75   :  { %1815 = vmatpush.bf16.msra.mxu0 %v2965_v52  ;;  %v3826_v8 = vld [vmem:[#allocation5 + $0x6f0] sm:$0xf0]  ;;  %v4548_v12 = vld [vmem:[#allocation5 + $0x7e4] sm:$0xf]  ;;  %v3701_v16 = vor.u32 %v4484_v4, %v3698_v6 }
  0x76   :  { %1829 = vmatpush.bf16.msra.mxu1 %v3093_v55  ;;  %v3954_v13 = vld [vmem:[#allocation5 + $0x7f0] sm:$0xf0]  ;;  %v3829_v18 = vor.u32 %v4516_v7, %v3826_v8  ;;  %v4448_v19 = vld [vmem:[#allocation5 + $0x4c4] sm:$0xf] }
  0x77   :  { %1843 = vmatpush.bf16.msra.mxu2 %v3221_v56  ;;  %v3554_v20 = vld [vmem:[#allocation5 + $0x4d0] sm:$0xf0]  ;;  %v4480_v21 = vld [vmem:[#allocation5 + $0x5c4] sm:$0xf]  ;;  %v3957_v22 = vor.u32 %v4548_v12, %v3954_v13 }
  0x78   :  { %1857 = vmatpush.bf16.msra.mxu3 %v3349_v61  ;;  %v3682_v23 = vld [vmem:[#allocation5 + $0x5d0] sm:$0xf0]  ;;  %v4512_v24 = vld [vmem:[#allocation5 + $0x6c4] sm:$0xf]  ;;  %v3557_v28 = vor.u32 %v4448_v19, %v3554_v20 }
  0x79   :  { %1816 = vmatpush.bf16.msra.mxu0 %v2949_v5  ;;  %v3810_v25 = vld [vmem:[#allocation5 + $0x6d0] sm:$0xf0]  ;;  %v4544_v26 = vld [vmem:[#allocation5 + $0x7c4] sm:$0xf]  ;;  %v3685_v29 = vor.u32 %v4480_v21, %v3682_v23 }
  0x7a   :  { %1830 = vmatpush.bf16.msra.mxu1 %v3077_v9  ;;  %v3938_v27 = vld [vmem:[#allocation5 + $0x7d0] sm:$0xf0]  ;;  %v3813_v30 = vor.u32 %v4512_v24, %v3810_v25  ;;  %v4444_v31 = vld [vmem:[#allocation5 + $0x4a4] sm:$0xf] }
  0x7b   :  { %1844 = vmatpush.bf16.msra.mxu2 %v3205_v11  ;;  %v3538_v32 = vld [vmem:[#allocation5 + $0x4b0] sm:$0xf0]  ;;  %v4476_v33 = vld [vmem:[#allocation5 + $0x5a4] sm:$0xf]  ;;  %v3941_v34 = vor.u32 %v4544_v26, %v3938_v27 }
  0x7c   :  { %1858 = vmatpush.bf16.msra.mxu3 %v3333_v14  ;;  %v3666_v35 = vld [vmem:[#allocation5 + $0x5b0] sm:$0xf0]  ;;  %v4508_v36 = vld [vmem:[#allocation5 + $0x6a4] sm:$0xf]  ;;  %1817 = vmatmul.bf16.vlgmr.msra.gmra.mxu0 %v4879_v58  ;;  %v3541_v41 = vor.u32 %v4444_v31, %v3538_v32 }
  0x7d   :  { %1865 = vmatpush.bf16.msrb.mxu0 %v3573_v15  ;;  %v3794_v37 = vld [vmem:[#allocation5 + $0x6b0] sm:$0xf0]  ;;  %v4540_v38 = vld [vmem:[#allocation5 + $0x7a4] sm:$0xf]  ;;  %1831 = vmatmul.bf16.vlgmr.msra.gmra.mxu1 %v4885_v10  ;;  %v3669_v42 = vor.u32 %v4476_v33, %v3666_v35 }
  0x7e   :  { %1879 = vmatpush.bf16.msrb.mxu1 %v3701_v16  ;;  %v3922_v40 = vld [vmem:[#allocation5 + $0x7b0] sm:$0xf0]  ;;  %1845 = vmatmul.bf16.vlgmr.msra.gmra.mxu2 %v4881_v1  ;;  %v3797_v45 = vor.u32 %v4508_v36, %v3794_v37  ;;  %v4440_v46 = vld [vmem:[#allocation5 + $0x484] sm:$0xf] }
  0x7f   :  { %1893 = vmatpush.bf16.msrb.mxu2 %v3829_v18  ;;  %1859 = vmatmul.bf16.vlgmr.msra.gmra.mxu3 %v4887_v17  ;;  %v3522_v48 = vld [vmem:[#allocation5 + $0x490] sm:$0xf0]  ;;  %v4472_v49 = vld [vmem:[#allocation5 + $0x584] sm:$0xf]  ;;  %v3925_v50 = vor.u32 %v4540_v38, %v3922_v40 }
  0x80   :  { %1907 = vmatpush.bf16.msrb.mxu3 %v3957_v22  ;;  %v3650_v51 = vld [vmem:[#allocation5 + $0x590] sm:$0xf0]  ;;  %v4504_v52 = vld [vmem:[#allocation5 + $0x684] sm:$0xf]  ;;  %v3525_v56 = vor.u32 %v4440_v46, %v3522_v48  ;;  %v3064_v48 = vld [vmem:[#allocation5 + $0xe8] sm:$0xf] }
  0x81   :  { %1866 = vmatpush.bf16.msrb.mxu0 %v3557_v28  ;;  %v3778_v53 = vld [vmem:[#allocation5 + $0x690] sm:$0xf0]  ;;  %v4536_v54 = vld [vmem:[#allocation5 + $0x784] sm:$0xf]  ;;  %v3653_v57 = vor.u32 %v4472_v49, %v3650_v51  ;;  %v4327_v49 = vld [vmem:[#allocation5 + $0xf4] sm:$0xf0] }
  0x82   :  { %1880 = vmatpush.bf16.msrb.mxu1 %v3685_v29  ;;  %v3906_v55 = vld [vmem:[#allocation5 + $0x790] sm:$0xf0]  ;;  %v3781_v59 = vor.u32 %v4504_v52, %v3778_v53  ;;  %v4436_v60 = vld [vmem:[#allocation5 + $0x464] sm:$0xf]  ;;  %v4359_v52 = vld [vmem:[#allocation5 + $0x1f4] sm:$0xf0] }
  0x83   :  { %1894 = vmatpush.bf16.msrb.mxu2 %v3813_v30  ;;  %v3506_v61 = vld [vmem:[#allocation5 + $0x470] sm:$0xf0]  ;;  %v4468_v62 = vld [vmem:[#allocation5 + $0x564] sm:$0xf]  ;;  %v3909_v63 = vor.u32 %v4536_v54, %v3906_v55  ;;  %v3320_v53 = vld [vmem:[#allocation5 + $0x2e8] sm:$0xf] }
  0x84   :  { %1908 = vmatpush.bf16.msrb.mxu3 %v3941_v34  ;;  %v3634_v0 = vld [vmem:[#allocation5 + $0x570] sm:$0xf0]  ;;  %v4500_v2 = vld [vmem:[#allocation5 + $0x664] sm:$0xf]  ;;  %v3509_v6 = vor.u32 %v4436_v60, %v3506_v61  ;;  %v4391_v54 = vld [vmem:[#allocation5 + $0x2f4] sm:$0xf0]  ;;  %v3065_v61 = vor.u32 %v4327_v49, %v3064_v48 }
  0x85   :  { %1867 = vmatpush.bf16.msrb.mxu0 %v3541_v41  ;;  %v3762_v3 = vld [vmem:[#allocation5 + $0x670] sm:$0xf0]  ;;  %v4532_v4 = vld [vmem:[#allocation5 + $0x764] sm:$0xf]  ;;  %v3637_v7 = vor.u32 %v4468_v62, %v3634_v0  ;;  %v3048_v0 = vld [vmem:[#allocation5 + $0xc8] sm:$0xf] }
  0x86   :  { %1881 = vmatpush.bf16.msrb.mxu1 %v3669_v42  ;;  %v3890_v5 = vld [vmem:[#allocation5 + $0x770] sm:$0xf0]  ;;  %v3765_v8 = vor.u32 %v4500_v2, %v3762_v3  ;;  %v4432_v9 = vld [vmem:[#allocation5 + $0x444] sm:$0xf]  ;;  %v4323_v2 = vld [vmem:[#allocation5 + $0xd4] sm:$0xf0] }
  0x87   :  { %1895 = vmatpush.bf16.msrb.mxu2 %v3797_v45  ;;  %v3490_v11 = vld [vmem:[#allocation5 + $0x450] sm:$0xf0]  ;;  %v4464_v12 = vld [vmem:[#allocation5 + $0x544] sm:$0xf]  ;;  %v3893_v13 = vor.u32 %v4532_v4, %v3890_v5  ;;  %v3176_v3 = vld [vmem:[#allocation5 + $0x1c8] sm:$0xf] }
  0x88   :  { %1909 = vmatpush.bf16.msrb.mxu3 %v3925_v50  ;;  %v3618_v14 = vld [vmem:[#allocation5 + $0x550] sm:$0xf0]  ;;  %v4496_v15 = vld [vmem:[#allocation5 + $0x644] sm:$0xf]  ;;  %v3493_v20 = vor.u32 %v4432_v9, %v3490_v11  ;;  %v3192_v50 = vld [vmem:[#allocation5 + $0x1e8] sm:$0xf]  ;;  %v3049_v11 = vor.u32 %v4323_v2, %v3048_v0 }
  0x89   :  { %1868 = vmatpush.bf16.msrb.mxu0 %v3525_v56  ;;  %v3746_v16 = vld [vmem:[#allocation5 + $0x650] sm:$0xf0]  ;;  %v4528_v18 = vld [vmem:[#allocation5 + $0x744] sm:$0xf]  ;;  %v3621_v21 = vor.u32 %v4464_v12, %v3618_v14  ;;  %v3193_v62 = vor.u32 %v4359_v52, %v3192_v50  ;;  %v4355_v5 = vld [vmem:[#allocation5 + $0x1d4] sm:$0xf0] }
  0x8a   :  { %1882 = vmatpush.bf16.msrb.mxu1 %v3653_v57  ;;  %v3874_v19 = vld [vmem:[#allocation5 + $0x750] sm:$0xf0]  ;;  %v3749_v22 = vor.u32 %v4496_v15, %v3746_v16  ;;  %v4428_v23 = vld [vmem:[#allocation5 + $0x424] sm:$0xf]  ;;  %v3448_v57 = vld [vmem:[#allocation5 + $0x3e8] sm:$0xf]  ;;  %v3177_v12 = vor.u32 %v4355_v5, %v3176_v3 }
  0x8b   :  { %1896 = vmatpush.bf16.msrb.mxu2 %v3781_v59  ;;  %v3474_v24 = vld [vmem:[#allocation5 + $0x430] sm:$0xf0]  ;;  %v4460_v25 = vld [vmem:[#allocation5 + $0x524] sm:$0xf]  ;;  %v3877_v26 = vor.u32 %v4528_v18, %v3874_v19  ;;  %v4423_v59 = vld [vmem:[#allocation5 + $0x3f4] sm:$0xf0] }
  0x8c   :  { %1910 = vmatpush.bf16.msrb.mxu3 %v3909_v63  ;;  %v3602_v27 = vld [vmem:[#allocation5 + $0x530] sm:$0xf0]  ;;  %v4492_v28 = vld [vmem:[#allocation5 + $0x624] sm:$0xf]  ;;  %v3477_v32 = vor.u32 %v4428_v23, %v3474_v24  ;;  %v3321_v63 = vor.u32 %v4391_v54, %v3320_v53  ;;  %v3449_v4 = vor.u32 %v4423_v59, %v3448_v57  ;;  %v4419_v9 = vld [vmem:[#allocation5 + $0x3d4] sm:$0xf0] }
  0x8d   :  { %1869 = vmatpush.bf16.msrb.mxu0 %v3509_v6  ;;  %v3730_v29 = vld [vmem:[#allocation5 + $0x630] sm:$0xf0]  ;;  %v4524_v30 = vld [vmem:[#allocation5 + $0x724] sm:$0xf]  ;;  %v3605_v35 = vor.u32 %v4460_v25, %v3602_v27  ;;  %v3304_v6 = vld [vmem:[#allocation5 + $0x2c8] sm:$0xf] }
  0x8e   :  { %1883 = vmatpush.bf16.msrb.mxu1 %v3637_v7  ;;  %v3858_v31 = vld [vmem:[#allocation5 + $0x730] sm:$0xf0]  ;;  %v4424_v33 = vld [vmem:[#allocation5 + $0x404] sm:$0xf]  ;;  %v3733_v36 = vor.u32 %v4492_v28, %v3730_v29  ;;  %v4387_v7 = vld [vmem:[#allocation5 + $0x2d4] sm:$0xf0] }
  0x8f   :  { %1897 = vmatpush.bf16.msrb.mxu2 %v3765_v8  ;;  %v3458_v34 = vld [vmem:[#allocation5 + $0x410] sm:$0xf0]  ;;  %v4456_v37 = vld [vmem:[#allocation5 + $0x504] sm:$0xf]  ;;  %v3861_v41 = vor.u32 %v4524_v30, %v3858_v31  ;;  %v3432_v8 = vld [vmem:[#allocation5 + $0x3c8] sm:$0xf] }
  0x90   :  { %1911 = vmatpush.bf16.msrb.mxu3 %v3893_v13  ;;  %v3586_v38 = vld [vmem:[#allocation5 + $0x510] sm:$0xf0]  ;;  %v4488_v40 = vld [vmem:[#allocation5 + $0x604] sm:$0xf]  ;;  %v3461_v51 = vor.u32 %v4424_v33, %v3458_v34  ;;  %v3305_v13 = vor.u32 %v4387_v7, %v3304_v6  ;;  %v3032_v14 = vld [vmem:[#allocation5 + $0xa8] sm:$0xf]  ;;  %v3433_v18 = vor.u32 %v4419_v9, %v3432_v8 }
  0x91   :  { %1870 = vmatpush.bf16.msrb.mxu0 %v3493_v20  ;;  %v3714_v42 = vld [vmem:[#allocation5 + $0x610] sm:$0xf0]  ;;  %v4520_v45 = vld [vmem:[#allocation5 + $0x704] sm:$0xf]  ;;  %v3589_v55 = vor.u32 %v4456_v37, %v3586_v38  ;;  %v4319_v15 = vld [vmem:[#allocation5 + $0xb4] sm:$0xf0] }
  0x92   :  { %1884 = vmatpush.bf16.msrb.mxu1 %v3621_v21  ;;  %v3842_v46 = vld [vmem:[#allocation5 + $0x710] sm:$0xf0]  ;;  %v3717_v56 = vor.u32 %v4488_v40, %v3714_v42  ;;  %v3160_v16 = vld [vmem:[#allocation5 + $0x1a8] sm:$0xf]  ;;  %v4351_v19 = vld [vmem:[#allocation5 + $0x1b4] sm:$0xf0]  ;;  %v3033_v24 = vor.u32 %v4319_v15, %v3032_v14 }
  0x93   :  { %1898 = vmatpush.bf16.msrb.mxu2 %v3749_v22  ;;  %v3845_v60 = vor.u32 %v4520_v45, %v3842_v46  ;;  %v3288_v20 = vld [vmem:[#allocation5 + $0x2a8] sm:$0xf]  ;;  %v4383_v21 = vld [vmem:[#allocation5 + $0x2b4] sm:$0xf0]  ;;  %v3161_v25 = vor.u32 %v4351_v19, %v3160_v16 }
  0x94   :  { %1912 = vmatpush.bf16.msrb.mxu3 %v3877_v26  ;;  %v3416_v22 = vld [vmem:[#allocation5 + $0x3a8] sm:$0xf]  ;;  %v4415_v23 = vld [vmem:[#allocation5 + $0x3b4] sm:$0xf0]  ;;  %v3289_v26 = vor.u32 %v4383_v21, %v3288_v20 }
  0x95   :  { %1871 = vmatpush.bf16.msrb.mxu0 %v3477_v32  ;;  %v3016_v27 = vld [vmem:[#allocation5 + $0x88] sm:$0xf]  ;;  %v4315_v28 = vld [vmem:[#allocation5 + $0x94] sm:$0xf0]  ;;  %v3417_v30 = vor.u32 %v4415_v23, %v3416_v22 }
  0x96   :  { %1885 = vmatpush.bf16.msrb.mxu1 %v3605_v35  ;;  %v3144_v29 = vld [vmem:[#allocation5 + $0x188] sm:$0xf]  ;;  %v4347_v31 = vld [vmem:[#allocation5 + $0x194] sm:$0xf0] }
  0x97   :  { %1899 = vmatpush.bf16.msrb.mxu2 %v3733_v36  ;;  %v3272_v32 = vld [vmem:[#allocation5 + $0x288] sm:$0xf]  ;;  %v4379_v33 = vld [vmem:[#allocation5 + $0x294] sm:$0xf0]  ;;  %v3017_v36 = vor.u32 %v4315_v28, %v3016_v27  ;;  %v3145_v37 = vor.u32 %v4347_v31, %v3144_v29 }
  0x98   :  { %1913 = vmatpush.bf16.msrb.mxu3 %v3861_v41  ;;  %v3400_v34 = vld [vmem:[#allocation5 + $0x388] sm:$0xf]  ;;  %v4411_v35 = vld [vmem:[#allocation5 + $0x394] sm:$0xf0]  ;;  %v3273_v38 = vor.u32 %v4379_v33, %v3272_v32 }
  0x99   :  { %1872 = vmatpush.bf16.msrb.mxu0 %v3461_v51  ;;  %v3000_v40 = vld [vmem:[#allocation5 + $0x68] sm:$0xf]  ;;  %v4311_v41 = vld [vmem:[#allocation5 + $0x74] sm:$0xf0]  ;;  %v3401_v45 = vor.u32 %v4411_v35, %v3400_v34 }
  0x9a   :  { %1886 = vmatpush.bf16.msrb.mxu1 %v3589_v55  ;;  %v3128_v42 = vld [vmem:[#allocation5 + $0x168] sm:$0xf]  ;;  %v4343_v46 = vld [vmem:[#allocation5 + $0x174] sm:$0xf0]  ;;  %v3001_v52 = vor.u32 %v4311_v41, %v3000_v40 }
  0x9b   :  { %1900 = vmatpush.bf16.msrb.mxu2 %v3717_v56  ;;  %v3256_v48 = vld [vmem:[#allocation5 + $0x268] sm:$0xf]  ;;  %v4375_v49 = vld [vmem:[#allocation5 + $0x274] sm:$0xf0]  ;;  %v3129_v53 = vor.u32 %v4343_v46, %v3128_v42 }
  0x9c   :  { %1914 = vmatpush.bf16.msrb.mxu3 %v3845_v60  ;;  %1873 = vmatmul.bf16.vlgmr.msrb.gmra.mxu0 %v4891_v39  ;;  %v3384_v50 = vld [vmem:[#allocation5 + $0x368] sm:$0xf]  ;;  %v4407_v51 = vld [vmem:[#allocation5 + $0x374] sm:$0xf0]  ;;  %v3257_v54 = vor.u32 %v4375_v49, %v3256_v48 }
  0x9d   :  { %1921 = vmatpush.bf16.msra.mxu0 %v3065_v61  ;;  %1887 = vmatmul.bf16.vlgmr.msrb.gmra.mxu1 %v4895_v44  ;;  %v2984_v55 = vld [vmem:[#allocation5 + $0x48] sm:$0xf]  ;;  %v4307_v56 = vld [vmem:[#allocation5 + $0x54] sm:$0xf0]  ;;  %v3385_v59 = vor.u32 %v4407_v51, %v3384_v50 }
  0x9e   :  { %1935 = vmatpush.bf16.msra.mxu1 %v3193_v62  ;;  %1901 = vmatmul.bf16.vlgmr.msrb.gmra.mxu2 %v4893_v43  ;;  %v3112_v57 = vld [vmem:[#allocation5 + $0x148] sm:$0xf]  ;;  %v4339_v60 = vld [vmem:[#allocation5 + $0x154] sm:$0xf0]  ;;  %v2985_v2 = vor.u32 %v4307_v56, %v2984_v55 }
  0x9f   :  { %1949 = vmatpush.bf16.msra.mxu2 %v3321_v63  ;;  %1915 = vmatmul.bf16.vlgmr.msrb.gmra.mxu3 %v4897_v47  ;;  %v3240_v61 = vld [vmem:[#allocation5 + $0x248] sm:$0xf]  ;;  %v4371_v62 = vld [vmem:[#allocation5 + $0x254] sm:$0xf0]  ;;  %v3113_v3 = vor.u32 %v4339_v60, %v3112_v57 }
  0xa0   :  { %1963 = vmatpush.bf16.msra.mxu3 %v3449_v4  ;;  %v3368_v63 = vld [vmem:[#allocation5 + $0x348] sm:$0xf]  ;;  %v4403_v0 = vld [vmem:[#allocation5 + $0x354] sm:$0xf0]  ;;  %v3241_v4 = vor.u32 %v4371_v62, %v3240_v61 }
  0xa1   :  { %1922 = vmatpush.bf16.msra.mxu0 %v3049_v11  ;;  %v2968_v5 = vld [vmem:[#allocation5 + $0x28] sm:$0xf]  ;;  %v4303_v6 = vld [vmem:[#allocation5 + $0x34] sm:$0xf0]  ;;  %v3369_v8 = vor.u32 %v4403_v0, %v3368_v63 }
  0xa2   :  { %1936 = vmatpush.bf16.msra.mxu1 %v3177_v12  ;;  %v3096_v7 = vld [vmem:[#allocation5 + $0x128] sm:$0xf]  ;;  %v4335_v9 = vld [vmem:[#allocation5 + $0x134] sm:$0xf0]  ;;  %v2969_v15 = vor.u32 %v4303_v6, %v2968_v5 }
  0xa3   :  { %1950 = vmatpush.bf16.msra.mxu2 %v3305_v13  ;;  %v3224_v11 = vld [vmem:[#allocation5 + $0x228] sm:$0xf]  ;;  %v4367_v12 = vld [vmem:[#allocation5 + $0x234] sm:$0xf0]  ;;  %v3097_v19 = vor.u32 %v4335_v9, %v3096_v7 }
  0xa4   :  { %1964 = vmatpush.bf16.msra.mxu3 %v3433_v18  ;;  %v3352_v13 = vld [vmem:[#allocation5 + $0x328] sm:$0xf]  ;;  %v4399_v14 = vld [vmem:[#allocation5 + $0x334] sm:$0xf0]  ;;  %v3225_v20 = vor.u32 %v4367_v12, %v3224_v11 }
  0xa5   :  { %1923 = vmatpush.bf16.msra.mxu0 %v3033_v24  ;;  %v2952_v16 = vld [vmem:[#allocation5 + $0x8] sm:$0xf]  ;;  %v4299_v18 = vld [vmem:[#allocation5 + $0x14] sm:$0xf0]  ;;  %v3353_v24 = vor.u32 %v4399_v14, %v3352_v13 }
  0xa6   :  { %1937 = vmatpush.bf16.msra.mxu1 %v3161_v25  ;;  %v3080_v21 = vld [vmem:[#allocation5 + $0x108] sm:$0xf]  ;;  %v4331_v22 = vld [vmem:[#allocation5 + $0x114] sm:$0xf0]  ;;  %v2953_v31 = vor.u32 %v4299_v18, %v2952_v16 }
  0xa7   :  { %1951 = vmatpush.bf16.msra.mxu2 %v3289_v26  ;;  %v3208_v23 = vld [vmem:[#allocation5 + $0x208] sm:$0xf]  ;;  %v4363_v25 = vld [vmem:[#allocation5 + $0x214] sm:$0xf0]  ;;  %v3081_v35 = vor.u32 %v4331_v22, %v3080_v21 }
  0xa8   :  { %1965 = vmatpush.bf16.msra.mxu3 %v3417_v30  ;;  %v3336_v26 = vld [vmem:[#allocation5 + $0x308] sm:$0xf]  ;;  %v4395_v27 = vld [vmem:[#allocation5 + $0x314] sm:$0xf0] }
  0xa9   :  { %1924 = vmatpush.bf16.msra.mxu0 %v3017_v36  ;;  %v3576_v28 = vld [vmem:[#allocation5 + $0x4e8] sm:$0xf]  ;;  %v4455_v29 = vld [vmem:[#allocation5 + $0x4f4] sm:$0xf0]  ;;  %v3209_v36 = vor.u32 %v4363_v25, %v3208_v23  ;;  %v3337_v40 = vor.u32 %v4395_v27, %v3336_v26 }
  0xaa   :  { %1938 = vmatpush.bf16.msra.mxu1 %v3145_v37  ;;  %v3704_v30 = vld [vmem:[#allocation5 + $0x5e8] sm:$0xf]  ;;  %v4487_v32 = vld [vmem:[#allocation5 + $0x5f4] sm:$0xf0]  ;;  %v3577_v41 = vor.u32 %v4455_v29, %v3576_v28 }
  0xab   :  { %1952 = vmatpush.bf16.msra.mxu2 %v3273_v38  ;;  %v3832_v33 = vld [vmem:[#allocation5 + $0x6e8] sm:$0xf]  ;;  %v4519_v34 = vld [vmem:[#allocation5 + $0x6f4] sm:$0xf0]  ;;  %v3705_v42 = vor.u32 %v4487_v32, %v3704_v30 }
  0xac   :  { %1966 = vmatpush.bf16.msra.mxu3 %v3401_v45  ;;  %v3960_v37 = vld [vmem:[#allocation5 + $0x7e8] sm:$0xf]  ;;  %v4551_v38 = vld [vmem:[#allocation5 + $0x7f4] sm:$0xf0]  ;;  %v3833_v45 = vor.u32 %v4519_v34, %v3832_v33 }
  0xad   :  { %1925 = vmatpush.bf16.msra.mxu0 %v3001_v52  ;;  %v3560_v46 = vld [vmem:[#allocation5 + $0x4c8] sm:$0xf]  ;;  %v4451_v48 = vld [vmem:[#allocation5 + $0x4d4] sm:$0xf0]  ;;  %v3961_v50 = vor.u32 %v4551_v38, %v3960_v37 }
  0xae   :  { %1939 = vmatpush.bf16.msra.mxu1 %v3129_v53  ;;  %v3688_v49 = vld [vmem:[#allocation5 + $0x5c8] sm:$0xf]  ;;  %v4483_v51 = vld [vmem:[#allocation5 + $0x5d4] sm:$0xf0]  ;;  %v3561_v56 = vor.u32 %v4451_v48, %v3560_v46 }
  0xaf   :  { %1953 = vmatpush.bf16.msra.mxu2 %v3257_v54  ;;  %v3816_v52 = vld [vmem:[#allocation5 + $0x6c8] sm:$0xf]  ;;  %v4515_v53 = vld [vmem:[#allocation5 + $0x6d4] sm:$0xf0]  ;;  %v3689_v57 = vor.u32 %v4483_v51, %v3688_v49 }
  0xb0   :  { %1967 = vmatpush.bf16.msra.mxu3 %v3385_v59  ;;  %v3944_v54 = vld [vmem:[#allocation5 + $0x7c8] sm:$0xf]  ;;  %v4547_v55 = vld [vmem:[#allocation5 + $0x7d4] sm:$0xf0]  ;;  %v3817_v59 = vor.u32 %v4515_v53, %v3816_v52 }
  0xb1   :  { %1926 = vmatpush.bf16.msra.mxu0 %v2985_v2  ;;  %v3544_v60 = vld [vmem:[#allocation5 + $0x4a8] sm:$0xf]  ;;  %v4447_v61 = vld [vmem:[#allocation5 + $0x4b4] sm:$0xf0]  ;;  %v3945_v63 = vor.u32 %v4547_v55, %v3944_v54 }
  0xb2   :  { %1940 = vmatpush.bf16.msra.mxu1 %v3113_v3  ;;  %v3672_v62 = vld [vmem:[#allocation5 + $0x5a8] sm:$0xf]  ;;  %v4479_v0 = vld [vmem:[#allocation5 + $0x5b4] sm:$0xf0]  ;;  %v3545_v6 = vor.u32 %v4447_v61, %v3544_v60 }
  0xb3   :  { %1954 = vmatpush.bf16.msra.mxu2 %v3241_v4  ;;  %v3800_v2 = vld [vmem:[#allocation5 + $0x6a8] sm:$0xf]  ;;  %v4511_v3 = vld [vmem:[#allocation5 + $0x6b4] sm:$0xf0]  ;;  %v3673_v7 = vor.u32 %v4479_v0, %v3672_v62 }
  0xb4   :  { %1968 = vmatpush.bf16.msra.mxu3 %v3369_v8  ;;  %v3928_v4 = vld [vmem:[#allocation5 + $0x7a8] sm:$0xf]  ;;  %v4543_v5 = vld [vmem:[#allocation5 + $0x7b4] sm:$0xf0]  ;;  %v3801_v8 = vor.u32 %v4511_v3, %v3800_v2 }
  0xb5   :  { %1927 = vmatpush.bf16.msra.mxu0 %v2969_v15  ;;  %v3528_v9 = vld [vmem:[#allocation5 + $0x488] sm:$0xf]  ;;  %v4443_v11 = vld [vmem:[#allocation5 + $0x494] sm:$0xf0]  ;;  %v3929_v13 = vor.u32 %v4543_v5, %v3928_v4 }
  0xb6   :  { %1941 = vmatpush.bf16.msra.mxu1 %v3097_v19  ;;  %v3656_v12 = vld [vmem:[#allocation5 + $0x588] sm:$0xf]  ;;  %v4475_v14 = vld [vmem:[#allocation5 + $0x594] sm:$0xf0] }
  0xb7   :  { %1955 = vmatpush.bf16.msra.mxu2 %v3225_v20  ;;  %v3784_v15 = vld [vmem:[#allocation5 + $0x688] sm:$0xf]  ;;  %v4507_v16 = vld [vmem:[#allocation5 + $0x694] sm:$0xf0]  ;;  %v3529_v20 = vor.u32 %v4443_v11, %v3528_v9  ;;  %v3657_v21 = vor.u32 %v4475_v14, %v3656_v12  ;;  %v4325_v11 = vld [vmem:[#allocation5 + $0xec] sm:$0xf] }
  0xb8   :  { %1969 = vmatpush.bf16.msra.mxu3 %v3353_v24  ;;  %v3912_v18 = vld [vmem:[#allocation5 + $0x788] sm:$0xf]  ;;  %v4539_v19 = vld [vmem:[#allocation5 + $0x794] sm:$0xf0]  ;;  %v3785_v22 = vor.u32 %v4507_v16, %v3784_v15  ;;  %v3066_v12 = vld [vmem:[#allocation5 + $0xf8] sm:$0xf0] }
  0xb9   :  { %1928 = vmatpush.bf16.msra.mxu0 %v2953_v31  ;;  %v3512_v23 = vld [vmem:[#allocation5 + $0x468] sm:$0xf]  ;;  %v4439_v24 = vld [vmem:[#allocation5 + $0x474] sm:$0xf0]  ;;  %v3913_v26 = vor.u32 %v4539_v19, %v3912_v18  ;;  %v3194_v15 = vld [vmem:[#allocation5 + $0x1f8] sm:$0xf0] }
  0xba   :  { %1942 = vmatpush.bf16.msra.mxu1 %v3081_v35  ;;  %v3640_v25 = vld [vmem:[#allocation5 + $0x568] sm:$0xf]  ;;  %v4471_v27 = vld [vmem:[#allocation5 + $0x574] sm:$0xf0]  ;;  %v3513_v32 = vor.u32 %v4439_v24, %v3512_v23  ;;  %v4389_v16 = vld [vmem:[#allocation5 + $0x2ec] sm:$0xf]  ;;  %v3069_v24 = vor.u32 %v4325_v11, %v3066_v12 }
  0xbb   :  { %1956 = vmatpush.bf16.msra.mxu2 %v3209_v36  ;;  %v3768_v28 = vld [vmem:[#allocation5 + $0x668] sm:$0xf]  ;;  %v4503_v29 = vld [vmem:[#allocation5 + $0x674] sm:$0xf0]  ;;  %v3641_v33 = vor.u32 %v4471_v27, %v3640_v25  ;;  %v3322_v18 = vld [vmem:[#allocation5 + $0x2f8] sm:$0xf0] }
  0xbc   :  { %1970 = vmatpush.bf16.msra.mxu3 %v3337_v40  ;;  %1929 = vmatmul.bf16.vlgmr.msra.gmra.mxu0 %v4879_v58  ;;  %v3896_v30 = vld [vmem:[#allocation5 + $0x768] sm:$0xf]  ;;  %v4535_v31 = vld [vmem:[#allocation5 + $0x774] sm:$0xf0]  ;;  %v3769_v34 = vor.u32 %v4503_v29, %v3768_v28  ;;  %v4321_v27 = vld [vmem:[#allocation5 + $0xcc] sm:$0xf] }
  0xbd   :  { %1977 = vmatpush.bf16.msrb.mxu0 %v3577_v41  ;;  %1943 = vmatmul.bf16.vlgmr.msra.gmra.mxu1 %v4885_v10  ;;  %v3496_v35 = vld [vmem:[#allocation5 + $0x448] sm:$0xf]  ;;  %v4435_v36 = vld [vmem:[#allocation5 + $0x454] sm:$0xf0]  ;;  %v3897_v38 = vor.u32 %v4535_v31, %v3896_v30  ;;  %v3050_v28 = vld [vmem:[#allocation5 + $0xd8] sm:$0xf0] }
  0xbe   :  { %1991 = vmatpush.bf16.msrb.mxu1 %v3705_v42  ;;  %1957 = vmatmul.bf16.vlgmr.msra.gmra.mxu2 %v4881_v1  ;;  %v3624_v37 = vld [vmem:[#allocation5 + $0x548] sm:$0xf]  ;;  %v4467_v40 = vld [vmem:[#allocation5 + $0x554] sm:$0xf0]  ;;  %v3497_v48 = vor.u32 %v4435_v36, %v3496_v35  ;;  %v4353_v29 = vld [vmem:[#allocation5 + $0x1cc] sm:$0xf]  ;;  %v3053_v36 = vor.u32 %v4321_v27, %v3050_v28 }
  0xbf   :  { %2005 = vmatpush.bf16.msrb.mxu2 %v3833_v45  ;;  %1971 = vmatmul.bf16.vlgmr.msra.gmra.mxu3 %v4887_v17  ;;  %v3752_v41 = vld [vmem:[#allocation5 + $0x648] sm:$0xf]  ;;  %v4499_v42 = vld [vmem:[#allocation5 + $0x654] sm:$0xf0]  ;;  %v3625_v49 = vor.u32 %v4467_v40, %v3624_v37  ;;  %v3178_v31 = vld [vmem:[#allocation5 + $0x1d8] sm:$0xf0] }
  0xc0   :  { %2019 = vmatpush.bf16.msrb.mxu3 %v3961_v50  ;;  %v3880_v45 = vld [vmem:[#allocation5 + $0x748] sm:$0xf]  ;;  %v4531_v46 = vld [vmem:[#allocation5 + $0x754] sm:$0xf0]  ;;  %v3753_v50 = vor.u32 %v4499_v42, %v3752_v41  ;;  %v3434_v35 = vld [vmem:[#allocation5 + $0x3d8] sm:$0xf0]  ;;  %v3181_v37 = vor.u32 %v4353_v29, %v3178_v31 }
  0xc1   :  { %1978 = vmatpush.bf16.msrb.mxu0 %v3561_v56  ;;  %v3480_v51 = vld [vmem:[#allocation5 + $0x428] sm:$0xf]  ;;  %v4431_v52 = vld [vmem:[#allocation5 + $0x434] sm:$0xf0]  ;;  %v3881_v54 = vor.u32 %v4531_v46, %v3880_v45  ;;  %v4317_v40 = vld [vmem:[#allocation5 + $0xac] sm:$0xf] }
  0xc2   :  { %1992 = vmatpush.bf16.msrb.mxu1 %v3689_v57  ;;  %v3608_v53 = vld [vmem:[#allocation5 + $0x528] sm:$0xf]  ;;  %v4463_v55 = vld [vmem:[#allocation5 + $0x534] sm:$0xf0]  ;;  %v3481_v61 = vor.u32 %v4431_v52, %v3480_v51  ;;  %v3034_v41 = vld [vmem:[#allocation5 + $0xb8] sm:$0xf0] }
  0xc3   :  { %2006 = vmatpush.bf16.msrb.mxu2 %v3817_v59  ;;  %v3736_v56 = vld [vmem:[#allocation5 + $0x628] sm:$0xf]  ;;  %v4495_v57 = vld [vmem:[#allocation5 + $0x634] sm:$0xf0]  ;;  %v3609_v0 = vor.u32 %v4463_v55, %v3608_v53  ;;  %v4349_v42 = vld [vmem:[#allocation5 + $0x1ac] sm:$0xf]  ;;  %v3037_v52 = vor.u32 %v4317_v40, %v3034_v41 }
  0xc4   :  { %2020 = vmatpush.bf16.msrb.mxu3 %v3945_v63  ;;  %v3864_v59 = vld [vmem:[#allocation5 + $0x728] sm:$0xf]  ;;  %v4527_v60 = vld [vmem:[#allocation5 + $0x734] sm:$0xf0]  ;;  %v3737_v2 = vor.u32 %v4495_v57, %v3736_v56  ;;  %v3162_v46 = vld [vmem:[#allocation5 + $0x1b8] sm:$0xf0] }
  0xc5   :  { %1979 = vmatpush.bf16.msrb.mxu0 %v3545_v6  ;;  %v3464_v62 = vld [vmem:[#allocation5 + $0x408] sm:$0xf]  ;;  %v4427_v63 = vld [vmem:[#allocation5 + $0x414] sm:$0xf0]  ;;  %v3865_v6 = vor.u32 %v4527_v60, %v3864_v59  ;;  %v3418_v51 = vld [vmem:[#allocation5 + $0x3b8] sm:$0xf0]  ;;  %v3165_v53 = vor.u32 %v4349_v42, %v3162_v46 }
  0xc6   :  { %1993 = vmatpush.bf16.msrb.mxu1 %v3673_v7  ;;  %v3592_v3 = vld [vmem:[#allocation5 + $0x508] sm:$0xf]  ;;  %v4459_v4 = vld [vmem:[#allocation5 + $0x514] sm:$0xf0]  ;;  %v3465_v14 = vor.u32 %v4427_v63, %v3464_v62  ;;  %v4313_v55 = vld [vmem:[#allocation5 + $0x8c] sm:$0xf] }
  0xc7   :  { %2007 = vmatpush.bf16.msrb.mxu2 %v3801_v8  ;;  %v3720_v5 = vld [vmem:[#allocation5 + $0x608] sm:$0xf]  ;;  %v4491_v7 = vld [vmem:[#allocation5 + $0x614] sm:$0xf0]  ;;  %v3593_v19 = vor.u32 %v4459_v4, %v3592_v3  ;;  %v3018_v56 = vld [vmem:[#allocation5 + $0x98] sm:$0xf0]  ;;  %v4919_v3 = vpop.f32.mrf.mxu0 }
  0xc8   :  { %2021 = vmatpush.bf16.msrb.mxu3 %v3929_v13  ;;  %v3848_v8 = vld [vmem:[#allocation5 + $0x708] sm:$0xf]  ;;  %v4523_v9 = vld [vmem:[#allocation5 + $0x714] sm:$0xf0]  ;;  %v4357_v13 = vld [vmem:[#allocation5 + $0x1ec] sm:$0xf] }
  0xc9   :  { %1980 = vmatpush.bf16.msrb.mxu0 %v3529_v20  ;;  %v3721_v20 = vor.u32 %v4491_v7, %v3720_v5  ;;  %v3849_v23 = vor.u32 %v4523_v9, %v3848_v8  ;;  %v3197_v25 = vor.u32 %v4357_v13, %v3194_v15  ;;  %v4345_v57 = vld [vmem:[#allocation5 + $0x18c] sm:$0xf]  ;;  %v3146_v60 = vld [vmem:[#allocation5 + $0x198] sm:$0xf0]  ;;  %v4921_v9 = vpop.f32.mrf.mxu1 }
  0xca   :  { %1994 = vmatpush.bf16.msrb.mxu1 %v3657_v21  ;;  %v4421_v21 = vld [vmem:[#allocation5 + $0x3ec] sm:$0xf]  ;;  %v3274_v62 = vld [vmem:[#allocation5 + $0x298] sm:$0xf0]  ;;  %v3149_v4 = vor.u32 %v4345_v57, %v3146_v60 }
  0xcb   :  { %2008 = vmatpush.bf16.msrb.mxu2 %v3785_v22  ;;  %v3450_v22 = vld [vmem:[#allocation5 + $0x3f8] sm:$0xf0]  ;;  %v4409_v63 = vld [vmem:[#allocation5 + $0x38c] sm:$0xf] }
  0xcc   :  { %2022 = vmatpush.bf16.msrb.mxu3 %v3913_v26  ;;  %v3325_v26 = vor.u32 %v4389_v16, %v3322_v18  ;;  %v3453_v30 = vor.u32 %v4421_v21, %v3450_v22  ;;  %v3002_v7 = vld [vmem:[#allocation5 + $0x78] sm:$0xf0]  ;;  %v4341_v8 = vld [vmem:[#allocation5 + $0x16c] sm:$0xf] }
  0xcd   :  { %1981 = vmatpush.bf16.msrb.mxu0 %v3513_v32  ;;  %v4385_v32 = vld [vmem:[#allocation5 + $0x2cc] sm:$0xf]  ;;  %v3130_v12 = vld [vmem:[#allocation5 + $0x178] sm:$0xf0] }
  0xce   :  { %1995 = vmatpush.bf16.msrb.mxu1 %v3641_v33  ;;  %v3306_v33 = vld [vmem:[#allocation5 + $0x2d8] sm:$0xf0]  ;;  %v4373_v13 = vld [vmem:[#allocation5 + $0x26c] sm:$0xf] }
  0xcf   :  { %2009 = vmatpush.bf16.msrb.mxu2 %v3769_v34  ;;  %v4417_v34 = vld [vmem:[#allocation5 + $0x3cc] sm:$0xf]  ;;  %v3386_v16 = vld [vmem:[#allocation5 + $0x378] sm:$0xf0] }
  0xd0   :  { %2023 = vmatpush.bf16.msrb.mxu3 %v3897_v38  ;;  %v3309_v38 = vor.u32 %v4385_v32, %v3306_v33  ;;  %v3437_v45 = vor.u32 %v4417_v34, %v3434_v35  ;;  %v4405_v15 = vld [vmem:[#allocation5 + $0x36c] sm:$0xf]  ;;  %v2986_v22 = vld [vmem:[#allocation5 + $0x58] sm:$0xf0]  ;;  %v4925_v32 = vpop.f32.mrf.mxu3 }
  0xd1   :  { %1982 = vmatpush.bf16.msrb.mxu0 %v3497_v48  ;;  %v4381_v48 = vld [vmem:[#allocation5 + $0x2ac] sm:$0xf]  ;;  %v3242_v27 = vld [vmem:[#allocation5 + $0x258] sm:$0xf0] }
  0xd2   :  { %1996 = vmatpush.bf16.msrb.mxu1 %v3625_v49  ;;  %v3290_v49 = vld [vmem:[#allocation5 + $0x2b8] sm:$0xf0]  ;;  %v4305_v21 = vld [vmem:[#allocation5 + $0x4c] sm:$0xf] }
  0xd3   :  { %2010 = vmatpush.bf16.msrb.mxu2 %v3753_v50  ;;  %v4413_v50 = vld [vmem:[#allocation5 + $0x3ac] sm:$0xf]  ;;  %v3370_v29 = vld [vmem:[#allocation5 + $0x358] sm:$0xf0]  ;;  %v2989_v31 = vor.u32 %v4305_v21, %v2986_v22 }
  0xd4   :  { %2024 = vmatpush.bf16.msrb.mxu3 %v3881_v54  ;;  %v3293_v54 = vor.u32 %v4381_v48, %v3290_v49  ;;  %v3421_v59 = vor.u32 %v4413_v50, %v3418_v51  ;;  %v4401_v28 = vld [vmem:[#allocation5 + $0x34c] sm:$0xf]  ;;  %v3098_v40 = vld [vmem:[#allocation5 + $0x138] sm:$0xf0]  ;;  %v4929_v49 = vpop.f32.mrf.mxu1 }
  0xd5   :  { %1983 = vmatpush.bf16.msrb.mxu0 %v3481_v61  ;;  %v4377_v61 = vld [vmem:[#allocation5 + $0x28c] sm:$0xf]  ;;  %v3226_v42 = vld [vmem:[#allocation5 + $0x238] sm:$0xf0] }
  0xd6   :  { %1997 = vmatpush.bf16.msrb.mxu1 %v3609_v0  ;;  %v3402_v0 = vld [vmem:[#allocation5 + $0x398] sm:$0xf0]  ;;  %v3277_v5 = vor.u32 %v4377_v61, %v3274_v62  ;;  %v4301_v35 = vld [vmem:[#allocation5 + $0x2c] sm:$0xf] }
  0xd7   :  { %2011 = vmatpush.bf16.msrb.mxu2 %v3737_v2  ;;  %v3021_v2 = vor.u32 %v4313_v55, %v3018_v56  ;;  %v3405_v11 = vor.u32 %v4409_v63, %v3402_v0  ;;  %v4365_v41 = vld [vmem:[#allocation5 + $0x22c] sm:$0xf]  ;;  %v3354_v48 = vld [vmem:[#allocation5 + $0x338] sm:$0xf0] }
  0xd8   :  { %2025 = vmatpush.bf16.msrb.mxu3 %v3865_v6  ;;  %v4309_v6 = vld [vmem:[#allocation5 + $0x6c] sm:$0xf]  ;;  %v3082_v56 = vld [vmem:[#allocation5 + $0x118] sm:$0xf0] }
  0xd9   :  { %1984 = vmatpush.bf16.msrb.mxu0 %v3465_v14  ;;  %v3258_v14 = vld [vmem:[#allocation5 + $0x278] sm:$0xf0]  ;;  %v3005_v18 = vor.u32 %v4309_v6, %v3002_v7  ;;  %v4397_v46 = vld [vmem:[#allocation5 + $0x32c] sm:$0xf] }
  0xda   :  { %1998 = vmatpush.bf16.msrb.mxu1 %v3593_v19  ;;  %v3133_v19 = vor.u32 %v4341_v8, %v3130_v12  ;;  %v4297_v51 = vld [vmem:[#allocation5 + $0xc] sm:$0xf]  ;;  %v3210_v60 = vld [vmem:[#allocation5 + $0x218] sm:$0xf0] }
  0xdb   :  { %2012 = vmatpush.bf16.msrb.mxu2 %v3721_v20  ;;  %v3261_v20 = vor.u32 %v4373_v13, %v3258_v14  ;;  %v4329_v55 = vld [vmem:[#allocation5 + $0x10c] sm:$0xf]  ;;  %v3338_v62 = vld [vmem:[#allocation5 + $0x318] sm:$0xf0] }
  0xdc   :  { %2026 = vmatpush.bf16.msrb.mxu3 %v3849_v23  ;;  %1985 = vmatmul.bf16.vlgmr.msrb.gmra.mxu0 %v4891_v39  ;;  %v4337_v23 = vld [vmem:[#allocation5 + $0x14c] sm:$0xf]  ;;  %v3578_v0 = vld [vmem:[#allocation5 + $0x4f8] sm:$0xf0]  ;;  %v3085_v8 = vor.u32 %v4329_v55, %v3082_v56 }
  0xdd   :  { %2033 = vmatpush.bf16.msra.mxu0 %v3069_v24  ;;  %1999 = vmatmul.bf16.vlgmr.msrb.gmra.mxu1 %v4895_v44  ;;  %v3389_v24 = vor.u32 %v4405_v15, %v3386_v16  ;;  %v4361_v57 = vld [vmem:[#allocation5 + $0x20c] sm:$0xf]  ;;  %v3834_v7 = vld [vmem:[#allocation5 + $0x6f8] sm:$0xf0] }
  0xde   :  { %2047 = vmatpush.bf16.msra.mxu1 %v3197_v25  ;;  %2013 = vmatmul.bf16.vlgmr.msrb.gmra.mxu2 %v4893_v43  ;;  %v3114_v25 = vld [vmem:[#allocation5 + $0x158] sm:$0xf0]  ;;  %v4393_v61 = vld [vmem:[#allocation5 + $0x30c] sm:$0xf] }
  0xdf   :  { %2061 = vmatpush.bf16.msra.mxu2 %v3325_v26  ;;  %2027 = vmatmul.bf16.vlgmr.msrb.gmra.mxu3 %v4897_v47  ;;  %v4369_v26 = vld [vmem:[#allocation5 + $0x24c] sm:$0xf]  ;;  %v3117_v33 = vor.u32 %v4337_v23, %v3114_v25  ;;  %v3962_v13 = vld [vmem:[#allocation5 + $0x7f8] sm:$0xf0]  ;;  %v3341_v15 = vor.u32 %v4393_v61, %v3338_v62 }
  0xe0   :  { %2075 = vmatpush.bf16.msra.mxu3 %v3453_v30  ;;  %v4923_v30 = vpop.f32.mrf.mxu2  ;;  %v3245_v34 = vor.u32 %v4369_v26, %v3242_v27  ;;  %v4453_v63 = vld [vmem:[#allocation5 + $0x4ec] sm:$0xf]  ;;  %v3562_v22 = vld [vmem:[#allocation5 + $0x4d8] sm:$0xf0] }
  0xe1   :  { %2034 = vmatpush.bf16.msra.mxu0 %v3053_v36  ;;  %v2970_v36 = vld [vmem:[#allocation5 + $0x38] sm:$0xf0]  ;;  %v4517_v6 = vld [vmem:[#allocation5 + $0x6ec] sm:$0xf]  ;;  %v3581_v16 = vor.u32 %v4453_v63, %v3578_v0 }
  0xe2   :  { %2048 = vmatpush.bf16.msra.mxu1 %v3181_v37  ;;  %v4333_v37 = vld [vmem:[#allocation5 + $0x12c] sm:$0xf]  ;;  %v2973_v50 = vor.u32 %v4301_v35, %v2970_v36  ;;  %v3690_v25 = vld [vmem:[#allocation5 + $0x5d8] sm:$0xf0] }
  0xe3   :  { %2062 = vmatpush.bf16.msra.mxu2 %v3309_v38  ;;  %v3373_v38 = vor.u32 %v4401_v28, %v3370_v29  ;;  %v4549_v12 = vld [vmem:[#allocation5 + $0x7ec] sm:$0xf]  ;;  %v3818_v27 = vld [vmem:[#allocation5 + $0x6d8] sm:$0xf0] }
  0xe4   :  { %2076 = vmatpush.bf16.msra.mxu3 %v3437_v45  ;;  %v4927_v45 = vpop.f32.mrf.mxu0  ;;  %v4449_v21 = vld [vmem:[#allocation5 + $0x4cc] sm:$0xf]  ;;  %v3530_v56 = vld [vmem:[#allocation5 + $0x498] sm:$0xf0] }
  0xe5   :  { %2035 = vmatpush.bf16.msra.mxu0 %v3037_v52  ;;  %v2954_v52 = vld [vmem:[#allocation5 + $0x18] sm:$0xf0]  ;;  %v4481_v23 = vld [vmem:[#allocation5 + $0x5cc] sm:$0xf] }
  0xe6   :  { %2049 = vmatpush.bf16.msra.mxu1 %v3165_v53  ;;  %v3101_v53 = vor.u32 %v4333_v37, %v3098_v40  ;;  %v4513_v26 = vld [vmem:[#allocation5 + $0x6cc] sm:$0xf]  ;;  %v3693_v35 = vor.u32 %v4481_v23, %v3690_v25  ;;  %v3914_v63 = vld [vmem:[#allocation5 + $0x798] sm:$0xf0] }
  0xe7   :  { %2063 = vmatpush.bf16.msra.mxu2 %v3293_v54  ;;  %v3229_v54 = vor.u32 %v4365_v41, %v3226_v42  ;;  %v4545_v29 = vld [vmem:[#allocation5 + $0x7cc] sm:$0xf]  ;;  %v3821_v36 = vor.u32 %v4513_v26, %v3818_v27  ;;  %v3674_v42 = vld [vmem:[#allocation5 + $0x5b8] sm:$0xf0] }
  0xe8   :  { %2077 = vmatpush.bf16.msra.mxu3 %v3421_v59  ;;  %v3357_v59 = vor.u32 %v4397_v46, %v3354_v48  ;;  %v4931_v14 = vpop.f32.mrf.mxu2  ;;  %v4445_v37 = vld [vmem:[#allocation5 + $0x4ac] sm:$0xf]  ;;  %v3802_v48 = vld [vmem:[#allocation5 + $0x6b8] sm:$0xf0] }
  0xe9   :  { %2036 = vmatpush.bf16.msra.mxu0 %v3021_v2  ;;  %v4485_v2 = vld [vmem:[#allocation5 + $0x5ec] sm:$0xf]  ;;  %v3498_v25 = vld [vmem:[#allocation5 + $0x458] sm:$0xf0] }
  0xea   :  { %2050 = vmatpush.bf16.msra.mxu1 %v3149_v4  ;;  %v2957_v4 = vor.u32 %v4297_v51, %v2954_v52  ;;  %v4477_v40 = vld [vmem:[#allocation5 + $0x5ac] sm:$0xf]  ;;  %v3930_v51 = vld [vmem:[#allocation5 + $0x7b8] sm:$0xf0] }
  0xeb   :  { %2064 = vmatpush.bf16.msra.mxu2 %v3277_v5  ;;  %v3706_v5 = vld [vmem:[#allocation5 + $0x5f8] sm:$0xf0]  ;;  %v4509_v46 = vld [vmem:[#allocation5 + $0x6ac] sm:$0xf] }
  0xec   :  { %2078 = vmatpush.bf16.msra.mxu3 %v3405_v11  ;;  %v3213_v11 = vor.u32 %v4361_v57, %v3210_v60  ;;  %v4935_v28 = vpop.f32.mrf.mxu0  ;;  %v4441_v55 = vld [vmem:[#allocation5 + $0x48c] sm:$0xf]  ;;  %v3658_v60 = vld [vmem:[#allocation5 + $0x598] sm:$0xf0] }
  0xed   :  { %2037 = vmatpush.bf16.msra.mxu0 %v3005_v18  ;;  %v4933_v18 = vpop.f32.mrf.mxu3  ;;  %v4505_v61 = vld [vmem:[#allocation5 + $0x68c] sm:$0xf] }
  0xee   :  { %2051 = vmatpush.bf16.msra.mxu1 %v3133_v19  ;;  %v3709_v19 = vor.u32 %v4485_v2, %v3706_v5  ;;  %v4437_v5 = vld [vmem:[#allocation5 + $0x46c] sm:$0xf] }
  0xef   :  { %2065 = vmatpush.bf16.msra.mxu2 %v3261_v20  ;;  %v3837_v20 = vor.u32 %v4517_v6, %v3834_v7  ;;  %v3514_v6 = vld [vmem:[#allocation5 + $0x478] sm:$0xf0]  ;;  %v4469_v7 = vld [vmem:[#allocation5 + $0x56c] sm:$0xf] }
  0xf0   :  { %2079 = vmatpush.bf16.msra.mxu3 %v3389_v24  ;;  %v3965_v24 = vor.u32 %v4549_v12, %v3962_v13  ;;  %v4943_v57 = vpop.f32.mrf.mxu2  ;;  %v3642_v12 = vld [vmem:[#allocation5 + $0x578] sm:$0xf0]  ;;  %v4501_v13 = vld [vmem:[#allocation5 + $0x66c] sm:$0xf] }
  0xf1   :  { %2038 = vmatpush.bf16.msra.mxu0 %v2989_v31  ;;  %v3946_v31 = vld [vmem:[#allocation5 + $0x7d8] sm:$0xf0]  ;;  %v4465_v26 = vld [vmem:[#allocation5 + $0x54c] sm:$0xf] }
  0xf2   :  { %2052 = vmatpush.bf16.msra.mxu1 %v3117_v33  ;;  %v4937_v33 = vpop.f32.mrf.mxu1  ;;  %v3949_v41 = vor.u32 %v4545_v29, %v3946_v31  ;;  %v3626_v29 = vld [vmem:[#allocation5 + $0x558] sm:$0xf0]  ;;  %v4497_v31 = vld [vmem:[#allocation5 + $0x64c] sm:$0xf] }
  0xf3   :  { %2066 = vmatpush.bf16.msra.mxu2 %v3245_v34  ;;  %v3565_v34 = vor.u32 %v4449_v21, %v3562_v22  ;;  %v3517_v21 = vor.u32 %v4437_v5, %v3514_v6  ;;  %v3645_v22 = vor.u32 %v4469_v7, %v3642_v12  ;;  %v4457_v5 = vld [vmem:[#allocation5 + $0x50c] sm:$0xf]  ;;  %v3594_v6 = vld [vmem:[#allocation5 + $0x518] sm:$0xf0] }
  0xf4   :  { %2080 = vmatpush.bf16.msra.mxu3 %v3373_v38  ;;  %v3546_v38 = vld [vmem:[#allocation5 + $0x4b8] sm:$0xf0]  ;;  %v4947_v0 = vpop.f32.mrf.mxu0  ;;  %v4489_v12 = vld [vmem:[#allocation5 + $0x60c] sm:$0xf] }
  0xf5   :  { %2039 = vmatpush.bf16.msra.mxu0 %v2973_v50  ;;  %v4541_v50 = vld [vmem:[#allocation5 + $0x7ac] sm:$0xf]  ;;  %v3549_v52 = vor.u32 %v4445_v37, %v3546_v38  ;;  %v4945_v62 = vpop.f32.mrf.mxu3 }
  0xf6   :  { %2053 = vmatpush.bf16.msra.mxu1 %v3101_v53  ;;  %v3677_v53 = vor.u32 %v4477_v40, %v3674_v42  ;;  %v3629_v42 = vor.u32 %v4465_v26, %v3626_v29 }
  0xf7   :  { %2067 = vmatpush.bf16.msra.mxu2 %v3229_v54  ;;  %v3805_v54 = vor.u32 %v4509_v46, %v3802_v48 }
  0xf8   :  { %2081 = vmatpush.bf16.msra.mxu3 %v3357_v59  ;;  %v3933_v59 = vor.u32 %v4541_v50, %v3930_v51  ;;  %v4954_v38 = vpop.f32.mrf.mxu2  ;;  %v4429_v50 = vld [vmem:[#allocation5 + $0x42c] sm:$0xf]  ;;  %v3482_v51 = vld [vmem:[#allocation5 + $0x438] sm:$0xf0] }
  0xf9   :  { %2040 = vmatpush.bf16.msra.mxu0 %v2957_v4 }
  0xfa   :  { %2054 = vmatpush.bf16.msra.mxu1 %v3085_v8  ;;  %v4949_v8 = vpop.f32.mrf.mxu1 }
  0xfb   :  { %2068 = vmatpush.bf16.msra.mxu2 %v3213_v11 }
  0xfc   :  { %2082 = vmatpush.bf16.msra.mxu3 %v3341_v15  ;;  %2041 = vmatmul.bf16.vlgmr.msra.gmra.mxu0 %v4879_v58  ;;  %v3786_v58 = vld [vmem:[#allocation5 + $0x698] sm:$0xf0]  ;;  %v1818_v48 = vpop.f32.mrf.mxu0 }
  0xfd   :  { %2089 = vmatpush.bf16.msrb.mxu0 %v3581_v16  ;;  %2055 = vmatmul.bf16.vlgmr.msra.gmra.mxu1 %v4885_v10  ;;  %v3533_v10 = vor.u32 %v4441_v55, %v3530_v56  ;;  %v3789_v4 = vor.u32 %v4505_v61, %v3786_v58  ;;  %v3770_v15 = vld [vmem:[#allocation5 + $0x678] sm:$0xf0]  ;;  %v4533_v16 = vld [vmem:[#allocation5 + $0x76c] sm:$0xf] }
  0xfe   :  { %2103 = vmatpush.bf16.msrb.mxu1 %v3709_v19  ;;  %2069 = vmatmul.bf16.vlgmr.msra.gmra.mxu2 %v4881_v1  ;;  %v4473_v1 = vld [vmem:[#allocation5 + $0x58c] sm:$0xf]  ;;  %v3898_v19 = vld [vmem:[#allocation5 + $0x778] sm:$0xf0]  ;;  %v3773_v23 = vor.u32 %v4501_v13, %v3770_v15 }
  0xff   :  { %2117 = vmatpush.bf16.msrb.mxu2 %v3837_v20  ;;  %2083 = vmatmul.bf16.vlgmr.msra.gmra.mxu3 %v4887_v17  ;;  %v4537_v17 = vld [vmem:[#allocation5 + $0x78c] sm:$0xf]  ;;  %v3661_v2 = vor.u32 %v4473_v1, %v3658_v60  ;;  %v4951_v20 = vld [vmem:[#allocation7] sm:$0xf]  ;;  %v3901_v27 = vor.u32 %v4533_v16, %v3898_v19  ;;  %v3610_v55 = vld [vmem:[#allocation5 + $0x538] sm:$0xf0] }
 0x100   :  { %2131 = vmatpush.bf16.msrb.mxu3 %v3965_v24  ;;  %v3917_v11 = vor.u32 %v4537_v17, %v3914_v63  ;;  %v4433_v24 = vld [vmem:[#allocation5 + $0x44c] sm:$0xf]  ;;  %v369_v37 = vperm.slane %v4951_v20, 0  ;;  %v3738_v1 = vld [vmem:[#allocation5 + $0x638] sm:$0xf0]  ;;  %v370_v60 = vperm.slane %v4951_v20, 1  ;;  %v3485_v17 = vor.u32 %v4429_v50, %v3482_v51 }
 0x101   :  { %2090 = vmatpush.bf16.msrb.mxu0 %v3565_v34  ;;  %v3754_v34 = vld [vmem:[#allocation5 + $0x658] sm:$0xf0]  ;;  %v3501_v40 = vor.u32 %v4433_v24, %v3498_v25  ;;  %v4493_v56 = vld [vmem:[#allocation5 + $0x62c] sm:$0xf]  ;;  %v1846_v25 = vpop.f32.mrf.mxu2 }
 0x102   :  { %2104 = vmatpush.bf16.msrb.mxu1 %v3693_v35  ;;  %v4529_v35 = vld [vmem:[#allocation5 + $0x74c] sm:$0xf]  ;;  %v3757_v46 = vor.u32 %v4497_v31, %v3754_v34  ;;  %v3866_v58 = vld [vmem:[#allocation5 + $0x738] sm:$0xf0]  ;;  %v1819_v16 = vadd.f32 %v1818_v48, %v370_v60  ;;  %v4080_v48 = vld [vmem:[#allocation8 + $0xe0] sm:$0xf] }
 0x103   :  { %2118 = vmatpush.bf16.msrb.mxu2 %v3821_v36  ;;  %v3882_v36 = vld [vmem:[#allocation5 + $0x758] sm:$0xf0]  ;;  %v4525_v61 = vld [vmem:[#allocation5 + $0x72c] sm:$0xf] }
 0x104   :  { %2132 = vmatpush.bf16.msrb.mxu3 %v3949_v41  ;;  %v4956_v41 = vpop.f32.mrf.mxu3  ;;  %v4425_v63 = vld [vmem:[#allocation5 + $0x40c] sm:$0xf]  ;;  %v3722_v13 = vld [vmem:[#allocation5 + $0x618] sm:$0xf0] }
 0x105   :  { %2091 = vmatpush.bf16.msrb.mxu0 %v3549_v52  ;;  %v4461_v52 = vld [vmem:[#allocation5 + $0x52c] sm:$0xf]  ;;  %v3850_v19 = vld [vmem:[#allocation5 + $0x718] sm:$0xf0] }
 0x106   :  { %2105 = vmatpush.bf16.msrb.mxu1 %v3677_v53  ;;  %v1709_v53 = vadd.f32 %v4927_v45, %v369_v37  ;;  %v3466_v45 = vld [vmem:[#allocation5 + $0x418] sm:$0xf0]  ;;  %v4521_v15 = vld [vmem:[#allocation5 + $0x70c] sm:$0xf] }
 0x107   :  { %2119 = vmatpush.bf16.msrb.mxu2 %v3805_v54  ;;  %v3885_v54 = vor.u32 %v4529_v35, %v3882_v36  ;;  %v4583_v24 = vld [vmem:[#allocation8 + $0xf4] sm:$0xf0]  ;;  %v3853_v34 = vor.u32 %v4521_v15, %v3850_v19  ;;  %v4581_v50 = vld [vmem:[#allocation8 + $0xe4] sm:$0xf0]  ;;  %v4056_v15 = vld [vmem:[#allocation8 + $0xb0] sm:$0xf] }
 0x108   :  { %2133 = vmatpush.bf16.msrb.mxu3 %v3933_v59  ;;  %v1832_v59 = vpop.f32.mrf.mxu1  ;;  %v1723_v7 = vadd.f32 %v4929_v49, %v1709_v53  ;;  %v3725_v49 = vor.u32 %v4489_v12, %v3722_v13  ;;  %v3992_v12 = vld [vmem:[#allocation8 + $0x30] sm:$0xf]  ;;  %v4559_v13 = vld [vmem:[#allocation8 + $0x34] sm:$0xf0] }
 0x109   :  { %2092 = vmatpush.bf16.msrb.mxu0 %v3533_v10  ;;  %v1707_v10 = vadd.f32 %v4919_v3, %v369_v37  ;;  %v3469_v3 = vor.u32 %v4425_v63, %v3466_v45  ;;  %v1833_v36 = vadd.f32 %v1832_v59, %v1819_v16  ;;  %v4579_v59 = vld [vmem:[#allocation8 + $0xd4] sm:$0xf0] }
 0x10a   :  { %2106 = vmatpush.bf16.msrb.mxu1 %v3661_v2  ;;  %v3613_v2 = vor.u32 %v4461_v52, %v3610_v55  ;;  %v1737_v31 = vadd.f32 %v4931_v14, %v1723_v7  ;;  %v4081_v55 = vor.u32 %v4581_v50, %v4080_v48  ;;  %v4575_v16 = vld [vmem:[#allocation8 + $0xb4] sm:$0xf0]  ;;  %v4040_v50 = vld [vmem:[#allocation8 + $0x90] sm:$0xf] }
 0x10b   :  { %2120 = vmatpush.bf16.msrb.mxu2 %v3789_v4  ;;  %v3741_v4 = vor.u32 %v4493_v56, %v3738_v1  ;;  %v1721_v26 = vadd.f32 %v4921_v9, %v1707_v10  ;;  %v1847_v53 = vadd.f32 %v1846_v25, %v1833_v36  ;;  %v4008_v56 = vld [vmem:[#allocation8 + $0x50] sm:$0xf]  ;;  %v4563_v1 = vld [vmem:[#allocation8 + $0x54] sm:$0xf0]  ;;  %v4048_v25 = vld [vmem:[#allocation8 + $0xa0] sm:$0xf] }
 0x10c   :  { %2134 = vmatpush.bf16.msrb.mxu3 %v3917_v11  ;;  %v3869_v11 = vor.u32 %v4525_v61, %v3866_v58  ;;  %v1860_v29 = vpop.f32.mrf.mxu3  ;;  %v1751_v52 = vadd.f32 %v4933_v18, %v1737_v31  ;;  %v4009_v18 = vor.u32 %v4563_v1, %v4008_v56  ;;  %v1848_v58 = vpop.f32.mrf.mxu2  ;;  %v4555_v48 = vld [vmem:[#allocation8 + $0x14] sm:$0xf0]  ;;  %v4553_v56 = vld [vmem:[#allocation8 + $0x4] sm:$0xf0] }
 0x10d   :  { %2093 = vmatpush.bf16.msrb.mxu0 %v3517_v21  ;;  %v4024_v21 = vld [vmem:[#allocation8 + $0x70] sm:$0xf]  ;;  %v1735_v9 = vadd.f32 %v4923_v30, %v1721_v26 }
 0x10e   :  { %2107 = vmatpush.bf16.msrb.mxu1 %v3645_v22  ;;  %v4567_v22 = vld [vmem:[#allocation8 + $0x74] sm:$0xf0]  ;;  %v4072_v30 = vld [vmem:[#allocation8 + $0xd0] sm:$0xf] }
 0x10f   :  { %2121 = vmatpush.bf16.msrb.mxu2 %v3773_v23  ;;  %v4088_v23 = vld [vmem:[#allocation8 + $0xf0] sm:$0xf]  ;;  %v4025_v35 = vor.u32 %v4567_v22, %v4024_v21  ;;  %v1749_v61 = vadd.f32 %v4925_v32, %v1735_v9  ;;  %v4073_v63 = vor.u32 %v4579_v59, %v4072_v30  ;;  %v4571_v9 = vld [vmem:[#allocation8 + $0x94] sm:$0xf0] }
 0x110   :  { %2135 = vmatpush.bf16.msrb.mxu3 %v3901_v27  ;;  %v3597_v27 = vor.u32 %v4457_v5, %v3594_v6  ;;  %v4089_v37 = vor.u32 %v4583_v24, %v4088_v23  ;;  %v1834_v51 = vpop.f32.mrf.mxu1  ;;  %v4057_v23 = vor.u32 %v4575_v16, %v4056_v15  ;;  %v3984_v24 = vld [vmem:[#allocation8 + $0x20] sm:$0xf]  ;;  %v4041_v59 = vor.u32 %v4571_v9, %v4040_v50  ;;  %v4082_v15 = vld [vmem:[#allocation8 + $0xe8] sm:$0xf0]  ;;  %v4589_v50 = vld [vmem:[#allocation8 + $0x124] sm:$0xf0] }
 0x111   :  { %2094 = vmatpush.bf16.msrb.mxu0 %v3501_v40  ;;  %v1820_v40 = vpop.f32.mrf.mxu0  ;;  %v1763_v45 = vadd.f32 %v4935_v28, %v1749_v61  ;;  %v3993_v28 = vor.u32 %v4559_v13, %v3992_v12  ;;  %v4032_v61 = vld [vmem:[#allocation8 + $0x80] sm:$0xf]  ;;  %v4580_v13 = vld [vmem:[#allocation8 + $0xe4] sm:$0xf] }
 0x112   :  { %2108 = vmatpush.bf16.msrb.mxu1 %v3629_v42  ;;  %v4016_v42 = vld [vmem:[#allocation8 + $0x60] sm:$0xf] }
 0x113   :  { %2122 = vmatpush.bf16.msrb.mxu2 %v3757_v46  ;;  %v4565_v46 = vld [vmem:[#allocation8 + $0x64] sm:$0xf0]  ;;  %v1777_v19 = vadd.f32 %v4937_v33, %v1763_v45 }
 0x114   :  { %2136 = vmatpush.bf16.msrb.mxu3 %v3885_v54  ;;  %v4017_v14 = vor.u32 %v4565_v46, %v4016_v42  ;;  %v1821_v54 = vadd.f32 %v1820_v40, %v370_v60  ;;  %v1862_v10 = vpop.f32.mrf.mxu3  ;;  %v3976_v46 = vld [vmem:[#allocation8 + $0x10] sm:$0xf] }
 0x115   :  { %2095 = vmatpush.bf16.msrb.mxu0 %v3485_v17  ;;  %v1765_v17 = vadd.f32 %v4947_v0, %v1751_v52  ;;  %v1791_v31 = vadd.f32 %v4943_v57, %v1777_v19  ;;  %v4144_v52 = vld [vmem:[#allocation8 + $0x160] sm:$0xf] }
 0x116   :  { %2109 = vmatpush.bf16.msrb.mxu1 %v3613_v2  ;;  %v1835_v60 = vadd.f32 %v1834_v51, %v1821_v54  ;;  %v4000_v2 = vld [vmem:[#allocation8 + $0x40] sm:$0xf]  ;;  %v3977_v54 = vor.u32 %v4555_v48, %v3976_v46  ;;  %v4066_v46 = vld [vmem:[#allocation8 + $0xc8] sm:$0xf0] }
 0x117   :  { %2123 = vmatpush.bf16.msrb.mxu2 %v3741_v4  ;;  %v4064_v4 = vld [vmem:[#allocation8 + $0xc0] sm:$0xf]  ;;  %v1779_v6 = vadd.f32 %v4949_v8, %v1765_v17  ;;  %v4557_v8 = vld [vmem:[#allocation8 + $0x24] sm:$0xf0]  ;;  %v1805_v57 = vadd.f32 %v4945_v62, %v1791_v31  ;;  %v4010_v31 = vld [vmem:[#allocation8 + $0x58] sm:$0xf0] }
 0x118   :  { %2137 = vmatpush.bf16.msrb.mxu3 %v3869_v11  ;;  %v1849_v7 = vadd.f32 %v1848_v58, %v1835_v60  ;;  %v3985_v36 = vor.u32 %v4557_v8, %v3984_v24  ;;  %v4566_v58 = vld [vmem:[#allocation8 + $0x74] sm:$0xf]  ;;  %v4136_v60 = vld [vmem:[#allocation8 + $0x150] sm:$0xf]  ;;  %v4112_v48 = vld [vmem:[#allocation8 + $0x120] sm:$0xf] }
 0x119   :  { %2096 = vmatpush.bf16.msrb.mxu0 %v3469_v3  ;;  %v1874_v5 = vpop.f32.mrf.mxu0  ;;  %v1793_v21 = vadd.f32 %v4954_v38, %v1779_v6  ;;  %v2153_v62 = vmul.f32 0.2, %v1805_v57  ;;  %vm2145_vm1 = vcmp.ge.f32.partialorder %v1805_v57, 0.0 }
 0x11a   :  { %2110 = vmatpush.bf16.msrb.mxu1 %v3597_v27  ;;  %v1863_v22 = vadd.f32 %v1862_v10, %v1849_v7  ;;  %v4573_v27 = vld [vmem:[#allocation8 + $0xa4] sm:$0xf0] }
 0x11b   :  { %2124 = vmatpush.bf16.msrb.mxu2 %v3725_v49  ;;  %v4152_v49 = vld [vmem:[#allocation8 + $0x170] sm:$0xf]  ;;  %v4049_v42 = vor.u32 %v4573_v27, %v4048_v25  ;;  %v2161_v16 = vsel %vm2145_vm1, %v1805_v57, %v2153_v62  ;;  %v3994_v57 = vld [vmem:[#allocation8 + $0x38] sm:$0xf0] }
 0x11c   :  { %2138 = vmatpush.bf16.msrb.mxu3 %v3853_v34  ;;  %2097 = vmatmul.bf16.vlgmr.msrb.gmra.mxu0 %v4891_v39  ;;  %v1861_v39 = vadd.f32 %v1860_v29, %v1847_v53  ;;  %v4599_v29 = vld [vmem:[#allocation8 + $0x174] sm:$0xf0]  ;;  %v1807_v34 = vadd.f32 %v4956_v41, %v1793_v21  ;;  %v4128_v21 = vld [vmem:[#allocation8 + $0x140] sm:$0xf]  ;;  %v4120_v25 = vld [vmem:[#allocation8 + $0x130] sm:$0xf] }
 0x11d   :  { %2563 = vmatpush.bf16.msra.mxu0 %v4025_v35  ;;  %2111 = vmatmul.bf16.vlgmr.msrb.gmra.mxu1 %v4895_v44  ;;  %v4561_v44 = vld [vmem:[#allocation8 + $0x44] sm:$0xf0]  ;;  %v4153_v38 = vor.u32 %v4599_v29, %v4152_v49  ;;  %v4085_v49 = vor.u32 %v4580_v13, %v4082_v15  ;;  %v4562_v29 = vld [vmem:[#allocation8 + $0x54] sm:$0xf]  ;;  %v4154_v62 = vld [vmem:[#allocation8 + $0x178] sm:$0xf0] }
 0x11e   :  { %2577 = vmatpush.bf16.msra.mxu1 %v4089_v37  ;;  %2125 = vmatmul.bf16.vlgmr.msrb.gmra.mxu2 %v4893_v43  ;;  %v4577_v43 = vld [vmem:[#allocation8 + $0xc4] sm:$0xf0]  ;;  %v4001_v32 = vor.u32 %v4561_v44, %v4000_v2  ;;  %v1875_v0 = vadd.f32 %v1874_v5, %v1861_v39  ;;  %vm2149_vm0 = vcmp.ge.f32.partialorder %v1807_v34, 0.0  ;;  %v2157_v53 = vmul.f32 0.2, %v1807_v34 }
 0x11f   :  { %2139 = vmatmul.bf16.vlgmr.msrb.gmra.mxu3 %v4897_v47  ;;  %v1888_v47 = vpop.f32.mrf.mxu1  ;;  %v4065_v11 = vor.u32 %v4577_v43, %v4064_v4  ;;  %2591 = vmatpush.bf16.msra.mxu2 %v4153_v38  ;;  %v4026_v39 = vld [vmem:[#allocation8 + $0x78] sm:$0xf0]  ;;  %v4582_v44 = vld [vmem:[#allocation8 + $0xf4] sm:$0xf]  ;;  %v4013_v38 = vor.u32 %v4562_v29, %v4010_v31  ;;  %v4552_v15 = vld [vmem:[#allocation8 + $0x4] sm:$0xf] }
 0x120   :  { %v1889_v3 = vadd.f32 %v1888_v47, %v1875_v0  ;;  %v4090_v4 = vld [vmem:[#allocation8 + $0xf8] sm:$0xf0]  ;;  %v2165_v45 = vsel %vm2149_vm0, %v1807_v34, %v2157_v53  ;;  %v4029_v7 = vor.u32 %v4566_v58, %v4026_v39  ;;  %v4564_v0 = vld [vmem:[#allocation8 + $0x64] sm:$0xf]  ;;  %v4578_v34 = vld [vmem:[#allocation8 + $0xd4] sm:$0xf] }
 0x121   :  { %2564 = vmatpush.bf16.msra.mxu0 %v4017_v14  ;;  %v1902_v26 = vpop.f32.mrf.mxu2  ;;  %v1876_v33 = vpop.f32.mrf.mxu0  ;;  %v4597_v14 = vld [vmem:[#allocation8 + $0x164] sm:$0xf0]  ;;  %v4093_v12 = vor.u32 %v4582_v44, %v4090_v4  ;;  %v4587_v53 = vld [vmem:[#allocation8 + $0x114] sm:$0xf0]  ;;  %v4050_v58 = vld [vmem:[#allocation8 + $0xa8] sm:$0xf0] }
 0x122   :  { %2578 = vmatpush.bf16.msra.mxu1 %v4081_v55  ;;  %v1916_v35 = vpop.f32.mrf.mxu3  ;;  %v1903_v37 = vadd.f32 %v1902_v26, %v1889_v3  ;;  %v1877_v40 = vadd.f32 %v1876_v33, %v1863_v22  ;;  %v4145_v41 = vor.u32 %v4597_v14, %v4144_v52  ;;  %v3968_v55 = vld [vmem:[#allocation8] sm:$0xf]  ;;  %v4593_v3 = vld [vmem:[#allocation8 + $0x144] sm:$0xf0]  ;;  %v4591_v26 = vld [vmem:[#allocation8 + $0x134] sm:$0xf0] }
 0x123   :  { %v3969_v5 = vor.u32 %v4553_v56, %v3968_v55  ;;  %v4129_v8 = vor.u32 %v4593_v3, %v4128_v21  ;;  %v4074_v33 = vld [vmem:[#allocation8 + $0xd8] sm:$0xf0]  ;;  %v4558_v52 = vld [vmem:[#allocation8 + $0x34] sm:$0xf]  ;;  %v4585_v39 = vld [vmem:[#allocation8 + $0x104] sm:$0xf0] }
 0x124   :  { %v1917_v1 = vadd.f32 %v1916_v35, %v1903_v37  ;;  %2592 = vmatpush.bf16.msra.mxu2 %v4145_v41  ;;  %v4121_v35 = vor.u32 %v4591_v26, %v4120_v25  ;;  %v4560_v37 = vld [vmem:[#allocation8 + $0x44] sm:$0xf]  ;;  %v4104_v41 = vld [vmem:[#allocation8 + $0x110] sm:$0xf]  ;;  %v4058_v55 = vld [vmem:[#allocation8 + $0xb8] sm:$0xf0] }
 0x125   :  { %2565 = vmatpush.bf16.msra.mxu0 %v4009_v18  ;;  %v4569_v18 = vld [vmem:[#allocation8 + $0x84] sm:$0xf0]  ;;  %v4105_v56 = vor.u32 %v4587_v53, %v4104_v41  ;;  %v4554_v4 = vld [vmem:[#allocation8 + $0x14] sm:$0xf]  ;;  %v4034_v21 = vld [vmem:[#allocation8 + $0x88] sm:$0xf0] }
 0x126   :  { %2579 = vmatpush.bf16.msra.mxu1 %v4073_v63  ;;  %v4595_v63 = vld [vmem:[#allocation8 + $0x154] sm:$0xf0]  ;;  %v4033_v6 = vor.u32 %v4569_v18, %v4032_v61  ;;  %vm2146_vm2 = vcmp.ge.f32.partialorder %v1917_v1, 0.0  ;;  %v3986_v61 = vld [vmem:[#allocation8 + $0x28] sm:$0xf0] }
 0x127   :  { %v1890_v51 = vpop.f32.mrf.mxu1  ;;  %v4137_v43 = vor.u32 %v4595_v63, %v4136_v60  ;;  %v4572_v18 = vld [vmem:[#allocation8 + $0xa4] sm:$0xf]  ;;  %v4598_v63 = vld [vmem:[#allocation8 + $0x174] sm:$0xf]  ;;  %v4138_v3 = vld [vmem:[#allocation8 + $0x158] sm:$0xf0] }
 0x128   :  { %v1891_v30 = vadd.f32 %v1890_v51, %v1877_v40  ;;  %v4002_v40 = vld [vmem:[#allocation8 + $0x48] sm:$0xf0]  ;;  %v4113_v51 = vor.u32 %v4589_v50, %v4112_v48  ;;  %v4053_v44 = vor.u32 %v4572_v18, %v4050_v58  ;;  %v4592_v29 = vld [vmem:[#allocation8 + $0x144] sm:$0xf]  ;;  %v4586_v41 = vld [vmem:[#allocation8 + $0x114] sm:$0xf] }
 0x129   :  { %2566 = vmatpush.bf16.msra.mxu0 %v4001_v32  ;;  %v1904_v17 = vpop.f32.mrf.mxu2  ;;  %v2154_v32 = vmul.f32 0.2, %v1917_v1  ;;  %2593 = vmatpush.bf16.msra.mxu2 %v4137_v43  ;;  %v4005_v9 = vor.u32 %v4560_v37, %v4002_v40  ;;  %v3978_v43 = vld [vmem:[#allocation8 + $0x18] sm:$0xf0]  ;;  %v4130_v31 = vld [vmem:[#allocation8 + $0x148] sm:$0xf0] }
 0x12a   :  { %2580 = vmatpush.bf16.msra.mxu1 %v4065_v11  ;;  %v1905_v10 = vadd.f32 %v1904_v17, %v1891_v30  ;;  %v1918_v2 = vpop.f32.mrf.mxu3  ;;  %v4018_v11 = vld [vmem:[#allocation8 + $0x68] sm:$0xf0]  ;;  %v4096_v17 = vld [vmem:[#allocation8 + $0x100] sm:$0xf]  ;;  %v4122_v37 = vld [vmem:[#allocation8 + $0x138] sm:$0xf0] }
 0x12b   :  { %v4021_v22 = vor.u32 %v4564_v0, %v4018_v11  ;;  %v4097_v60 = vor.u32 %v4585_v39, %v4096_v17  ;;  %v371_v0 = vperm.slane %v4951_v20, 2  ;;  %v3981_v11 = vor.u32 %v4554_v4, %v3978_v43  ;;  %v4588_v48 = vld [vmem:[#allocation8 + $0x124] sm:$0xf]  ;;  %v4114_v50 = vld [vmem:[#allocation8 + $0x128] sm:$0xf0] }
 0x12c   :  { %v1919_v47 = vadd.f32 %v1918_v2, %v1905_v10  ;;  %v4157_v2 = vor.u32 %v4598_v63, %v4154_v62  ;;  %v4106_v53 = vld [vmem:[#allocation8 + $0x118] sm:$0xf0] }
 0x12d   :  { %2567 = vmatpush.bf16.msra.mxu0 %v3993_v28  ;;  %v4981_v28 = vpack.c.bf16 %v2165_v45, %v2161_v16  ;;  %2594 = vmatpush.bf16.msra.mxu2 %v4129_v8  ;;  %v3970_v16 = vld [vmem:[#allocation8 + $0x8] sm:$0xf0] }
 0x12e   :  { %2581 = vmatpush.bf16.msra.mxu1 %v4057_v23  ;;  %vm2150_vm3 = vcmp.ge.f32.partialorder %v1919_v47, 0.0  ;;  %v2158_v19 = vmul.f32 0.2, %v1919_v47  ;;  %v2162_v23 = vsel %vm2146_vm2, %v1917_v1, %v2154_v32  ;;  %v3997_v1 = vor.u32 %v4558_v52, %v3994_v57  ;;  %v4042_v32 = vld [vmem:[#allocation8 + $0x98] sm:$0xf0] }
 0x130   :  { %v2166_v24 = vsel %vm2150_vm3, %v1919_v47, %v2158_v19  ;;  %v4568_v19 = vld [vmem:[#allocation8 + $0x84] sm:$0xf] }
 0x131   :  { %2568 = vmatpush.bf16.msra.mxu0 %v3985_v36  ;;  %v4983_v27 = vpack.c.bf16 %v2166_v24, %v2162_v23  ;;  %v4077_v36 = vor.u32 %v4578_v34, %v4074_v33  ;;  %2595 = vmatpush.bf16.msra.mxu2 %v4121_v35  ;;  %v3973_v24 = vor.u32 %v4552_v15, %v3970_v16 }
 0x132   :  { %2582 = vmatpush.bf16.msra.mxu1 %v4049_v42  ;;  %v4576_v42 = vld [vmem:[#allocation8 + $0xc4] sm:$0xf]  ;;  %v4037_v25 = vor.u32 %v4568_v19, %v4034_v21  ;;  %v4133_v35 = vor.u32 %v4592_v29, %v4130_v31  ;;  %v4184_v19 = vld [vmem:[#allocation8 + $0x1b0] sm:$0xf]  ;;  %v4607_v21 = vld [vmem:[#allocation8 + $0x1b4] sm:$0xf0] }
 0x133   :  { %v4069_v14 = vor.u32 %v4576_v42, %v4066_v46  ;;  %v4605_v29 = vld [vmem:[#allocation8 + $0x1a4] sm:$0xf0] }
 0x135   :  { %2569 = vmatpush.bf16.msra.mxu0 %v3977_v54  ;;  %v4574_v54 = vld [vmem:[#allocation8 + $0xb4] sm:$0xf]  ;;  %2596 = vmatpush.bf16.msra.mxu2 %v4113_v51 }
 0x136   :  { %2583 = vmatpush.bf16.msra.mxu1 %v4041_v59  ;;  %v4061_v30 = vor.u32 %v4574_v54, %v4058_v55  ;;  %v4556_v59 = vld [vmem:[#allocation8 + $0x24] sm:$0xf]  ;;  %v4109_v55 = vor.u32 %v4586_v41, %v4106_v53  ;;  %v372_v53 = vperm.slane %v4951_v20, 3 }
 0x137   :  { %v3989_v10 = vor.u32 %v4556_v59, %v3986_v61  ;;  %v4216_v59 = vld [vmem:[#allocation8 + $0x1f0] sm:$0xf]  ;;  %v4615_v61 = vld [vmem:[#allocation8 + $0x1f4] sm:$0xf0] }
 0x138   :  { %v4217_v18 = vor.u32 %v4615_v61, %v4216_v59  ;;  %v4606_v59 = vld [vmem:[#allocation8 + $0x1b4] sm:$0xf]  ;;  %v4186_v61 = vld [vmem:[#allocation8 + $0x1b8] sm:$0xf0] }
 0x139   :  { %2570 = vmatpush.bf16.msra.mxu0 %v3969_v5  ;;  %2597 = vmatpush.bf16.msra.mxu2 %v4105_v56  ;;  %v1930_v45 = vpop.f32.mrf.mxu0  ;;  %v4570_v5 = vld [vmem:[#allocation8 + $0x94] sm:$0xf]  ;;  %v4584_v56 = vld [vmem:[#allocation8 + $0x104] sm:$0xf] }
 0x13a   :  { %2584 = vmatpush.bf16.msra.mxu1 %v4033_v6  ;;  %v1944_v47 = vpop.f32.mrf.mxu1  ;;  %v4596_v6 = vld [vmem:[#allocation8 + $0x164] sm:$0xf]  ;;  %v4045_v13 = vor.u32 %v4570_v5, %v4042_v32  ;;  %v1931_v23 = vadd.f32 %v1930_v45, %v371_v0  ;;  %2605 = vmatpush.bf16.msra.mxu3 %v4217_v18  ;;  %v4200_v45 = vld [vmem:[#allocation8 + $0x1d0] sm:$0xf]  ;;  %v4611_v5 = vld [vmem:[#allocation8 + $0x1d4] sm:$0xf0]  ;;  %v4189_v18 = vor.u32 %v4606_v59, %v4186_v61 }
 0x13b   :  { %v4624_v59 = vld [vmem:[#allocation10 + $0x40] sm:$0xff] }
 0x13c   :  { %2571 = vmatmul.bf16.vlgmr.msra.gmra.mxu0 %v4981_v28  ;;  %v1945_v34 = vadd.f32 %v1944_v47, %v1931_v23  ;;  %v4201_v47 = vor.u32 %v4611_v5, %v4200_v45  ;;  %v4170_v45 = vld [vmem:[#allocation8 + $0x198] sm:$0xf0] }
 0x13d   :  { %2619 = vmatpush.bf16.msrb.mxu0 %v4029_v7  ;;  %2585 = vmatmul.bf16.vlgmr.msra.gmra.mxu1 %v4983_v27  ;;  %v4146_v7 = vld [vmem:[#allocation8 + $0x168] sm:$0xf0] }
 0x13e   :  { %2633 = vmatpush.bf16.msrb.mxu1 %v4093_v12  ;;  %2598 = vmatpush.bf16.msra.mxu2 %v4097_v60  ;;  %v4149_v12 = vor.u32 %v4596_v6, %v4146_v7 }
 0x141   :  { %2620 = vmatpush.bf16.msrb.mxu0 %v4021_v22  ;;  %v4594_v22 = vld [vmem:[#allocation8 + $0x154] sm:$0xf]  ;;  %v1958_v26 = vpop.f32.mrf.mxu2  ;;  %v1932_v33 = vpop.f32.mrf.mxu0 }
 0x142   :  { %2634 = vmatpush.bf16.msrb.mxu1 %v4085_v49  ;;  %2647 = vmatpush.bf16.msrb.mxu2 %v4157_v2  ;;  %v4141_v8 = vor.u32 %v4594_v22, %v4138_v3  ;;  %v1972_v49 = vpop.f32.mrf.mxu3  ;;  %v1959_v40 = vadd.f32 %v1958_v26, %v1945_v34  ;;  %v1933_v42 = vadd.f32 %v1932_v33, %v371_v0  ;;  %v4613_v2 = vld [vmem:[#allocation8 + $0x1e4] sm:$0xf0]  ;;  %v4168_v34 = vld [vmem:[#allocation8 + $0x190] sm:$0xf]  ;;  %v4603_v33 = vld [vmem:[#allocation8 + $0x194] sm:$0xf0] }
 0x144   :  { %v1973_v52 = vadd.f32 %v1972_v49, %v1959_v40  ;;  %v4176_v49 = vld [vmem:[#allocation8 + $0x1a0] sm:$0xf]  ;;  %v4614_v40 = vld [vmem:[#allocation8 + $0x1f4] sm:$0xf] }
 0x145   :  { %2621 = vmatpush.bf16.msrb.mxu0 %v4013_v38  ;;  %v1946_v38 = vpop.f32.mrf.mxu1  ;;  %v4177_v31 = vor.u32 %v4605_v29, %v4176_v49 }
 0x146   :  { %2635 = vmatpush.bf16.msrb.mxu1 %v4077_v36  ;;  %2648 = vmatpush.bf16.msrb.mxu2 %v4149_v12  ;;  %v4590_v36 = vld [vmem:[#allocation8 + $0x134] sm:$0xf]  ;;  %v4609_v12 = vld [vmem:[#allocation8 + $0x1c4] sm:$0xf0] }
 0x147   :  { %v4125_v46 = vor.u32 %v4590_v36, %v4122_v37  ;;  %v4601_v36 = vld [vmem:[#allocation8 + $0x184] sm:$0xf0] }
 0x149   :  { %2622 = vmatpush.bf16.msrb.mxu0 %v4005_v9  ;;  %v1960_v51 = vpop.f32.mrf.mxu2  ;;  %v4117_v9 = vor.u32 %v4588_v48, %v4114_v50  ;;  %v4612_v48 = vld [vmem:[#allocation8 + $0x1e4] sm:$0xf]  ;;  %v4210_v50 = vld [vmem:[#allocation8 + $0x1e8] sm:$0xf0] }
 0x14a   :  { %2636 = vmatpush.bf16.msrb.mxu1 %v4069_v14  ;;  %2649 = vmatpush.bf16.msrb.mxu2 %v4141_v8  ;;  %v1947_v14 = vadd.f32 %v1946_v38, %v1933_v42  ;;  %v1974_v57 = vpop.f32.mrf.mxu3  ;;  %v4160_v38 = vld [vmem:[#allocation8 + $0x180] sm:$0xf]  ;;  %v4218_v42 = vld [vmem:[#allocation8 + $0x1f8] sm:$0xf0] }
 0x14b   :  { %v4161_v37 = vor.u32 %v4601_v36, %v4160_v38  ;;  %v4623_v36 = vld [vmem:[#allocation10 + $0x38] sm:$0xff] }
 0x14d   :  { %2623 = vmatpush.bf16.msrb.mxu0 %v3997_v1  ;;  %v1961_v1 = vadd.f32 %v1960_v51, %v1947_v14  ;;  %v4213_v51 = vor.u32 %v4612_v48, %v4210_v50  ;;  %v4202_v14 = vld [vmem:[#allocation8 + $0x1d8] sm:$0xf0]  ;;  %v4618_v50 = vld [vmem:[#allocation10 + $0x10] sm:$0xff] }
 0x14e   :  { %2637 = vmatpush.bf16.msrb.mxu1 %v4061_v30  ;;  %2650 = vmatpush.bf16.msrb.mxu2 %v4133_v35  ;;  %v4169_v35 = vor.u32 %v4603_v33, %v4168_v34  ;;  %v4631_v48 = vld [vmem:[#allocation10 + $0x78] sm:$0xff] }
 0x14f   :  { %v1975_v17 = vadd.f32 %v1974_v57, %v1961_v1 }
 0x151   :  { %2624 = vmatpush.bf16.msrb.mxu0 %v3989_v10  ;;  %v4208_v10 = vld [vmem:[#allocation8 + $0x1e0] sm:$0xf] }
 0x152   :  { %2638 = vmatpush.bf16.msrb.mxu1 %v4053_v44  ;;  %2651 = vmatpush.bf16.msrb.mxu2 %v4125_v46  ;;  %v4209_v43 = vor.u32 %v4613_v2, %v4208_v10  ;;  %v4221_v46 = vor.u32 %v4614_v40, %v4218_v42  ;;  %v4621_v40 = vld [vmem:[#allocation10 + $0x28] sm:$0xff]  ;;  %v4620_v42 = vld [vmem:[#allocation10 + $0x20] sm:$0xff] }
 0x154   :  { %2606 = vmatpush.bf16.msra.mxu3 %v4209_v43  ;;  %v4602_v43 = vld [vmem:[#allocation8 + $0x194] sm:$0xf] }
 0x155   :  { %2625 = vmatpush.bf16.msrb.mxu0 %v3981_v11  ;;  %v4192_v11 = vld [vmem:[#allocation8 + $0x1c0] sm:$0xf]  ;;  %v4173_v5 = vor.u32 %v4602_v43, %v4170_v45 }
 0x156   :  { %2639 = vmatpush.bf16.msrb.mxu1 %v4045_v13  ;;  %2652 = vmatpush.bf16.msrb.mxu2 %v4117_v9  ;;  %v4193_v16 = vor.u32 %v4609_v12, %v4192_v11  ;;  %v4162_v11 = vld [vmem:[#allocation8 + $0x188] sm:$0xf0] }
 0x158   :  { %2607 = vmatpush.bf16.msra.mxu3 %v4201_v47 }
 0x159   :  { %2626 = vmatpush.bf16.msrb.mxu0 %v3973_v24  ;;  %v1986_v54 = vpop.f32.mrf.mxu0  ;;  %v4185_v24 = vor.u32 %v4607_v21, %v4184_v19 }
 0x15a   :  { %2640 = vmatpush.bf16.msrb.mxu1 %v4037_v25  ;;  %v1987_v30 = vadd.f32 %v1986_v54, %v1973_v52  ;;  %2653 = vmatpush.bf16.msrb.mxu2 %v4109_v55  ;;  %v4610_v52 = vld [vmem:[#allocation8 + $0x1d4] sm:$0xf]  ;;  %v4608_v54 = vld [vmem:[#allocation8 + $0x1c4] sm:$0xf] }
 0x15b   :  { %v4205_v41 = vor.u32 %v4610_v52, %v4202_v14  ;;  %v4629_v52 = vld [vmem:[#allocation10 + $0x68] sm:$0xff]  ;;  %v4616_v14 = vld [vmem:[#allocation10] sm:$0xff] }
 0x15c   :  { %2627 = vmatmul.bf16.vlgmr.msrb.gmra.mxu0 %v4981_v28  ;;  %v2000_v28 = vpop.f32.mrf.mxu1  ;;  %2608 = vmatpush.bf16.msra.mxu3 %v4193_v16 }
 0x15d   :  { %2641 = vmatmul.bf16.vlgmr.msrb.gmra.mxu1 %v4983_v27  ;;  %v4098_v27 = vld [vmem:[#allocation8 + $0x108] sm:$0xf0]  ;;  %v2001_v39 = vadd.f32 %v2000_v28, %v1987_v30  ;;  %2821 = vmatpush.bf16.msra.mxu0 %v4623_v36 }
 0x15e   :  { %v4101_v58 = vor.u32 %v4584_v56, %v4098_v27  ;;  %v4194_v28 = vld [vmem:[#allocation8 + $0x1c8] sm:$0xf0]  ;;  %2835 = vmatpush.bf16.msra.mxu1 %v4631_v48 }
 0x15f   :  { %v4197_v56 = vor.u32 %v4608_v54, %v4194_v28  ;;  %v4626_v54 = vld [vmem:[#allocation10 + $0x50] sm:$0xff] }
 0x160   :  { %2654 = vmatpush.bf16.msrb.mxu2 %v4101_v58  ;;  %2609 = vmatpush.bf16.msra.mxu3 %v4185_v24 }
 0x161   :  { %v2014_v60 = vpop.f32.mrf.mxu2  ;;  %v1988_v63 = vpop.f32.mrf.mxu0 }
 0x162   :  { %v2028_v62 = vpop.f32.mrf.mxu3  ;;  %v2015_v44 = vadd.f32 %v2014_v60, %v2001_v39  ;;  %v1989_v4 = vadd.f32 %v1988_v63, %v1975_v17  ;;  %v4604_v60 = vld [vmem:[#allocation8 + $0x1a4] sm:$0xf]  ;;  %v4178_v63 = vld [vmem:[#allocation8 + $0x1a8] sm:$0xf0] }
 0x164   :  { %v2002_v32 = vpop.f32.mrf.mxu1  ;;  %v2029_v6 = vadd.f32 %v2028_v62, %v2015_v44  ;;  %2610 = vmatpush.bf16.msra.mxu3 %v4177_v31  ;;  %v4181_v62 = vor.u32 %v4604_v60, %v4178_v63 }
 0x165   :  { %v2003_v7 = vadd.f32 %v2002_v32, %v1989_v4 }
 0x166   :  { %v2155_v22 = vmul.f32 0.2, %v2029_v6  ;;  %vm2147_vm4 = vcmp.ge.f32.partialorder %v2029_v6, 0.0 }
 0x168   :  { %v2163_v8 = vsel %vm2147_vm4, %v2029_v6, %v2155_v22  ;;  %2611 = vmatpush.bf16.msra.mxu3 %v4169_v35 }
 0x169   :  { %v2016_v0 = vpop.f32.mrf.mxu2 }
 0x16a   :  { %v2017_v13 = vadd.f32 %v2016_v0, %v2003_v7  ;;  %v2030_v15 = vpop.f32.mrf.mxu3  ;;  %v4600_v0 = vld [vmem:[#allocation8 + $0x184] sm:$0xf] }
 0x16b   :  { %v4165_v12 = vor.u32 %v4600_v0, %v4162_v11 }
 0x16c   :  { %v2031_v3 = vadd.f32 %v2030_v15, %v2017_v13  ;;  %2612 = vmatpush.bf16.msra.mxu3 %v4161_v37  ;;  %v4622_v37 = vld [vmem:[#allocation10 + $0x30] sm:$0xff] }
 0x16d   :  { %2822 = vmatpush.bf16.msra.mxu0 %v4622_v37 }
 0x16e   :  { %vm2151_vm5 = vcmp.ge.f32.partialorder %v2031_v3, 0.0  ;;  %v2159_v23 = vmul.f32 0.2, %v2031_v3 }
 0x170   :  { %v2167_v25 = vsel %vm2151_vm5, %v2031_v3, %v2159_v23  ;;  %2661 = vmatpush.bf16.msrb.mxu3 %v4221_v46  ;;  %v4619_v46 = vld [vmem:[#allocation10 + $0x18] sm:$0xff] }
 0x171   :  { %v2171_v26 = vpack.c.bf16 %v2167_v25, %v2163_v8  ;;  %2823 = vmatpush.bf16.msra.mxu0 %v4621_v40 }
 0x173   :  { %2599 = vmatmul.bf16.vlgmr.msra.gmra.mxu2 %v2171_v26 }
 0x174   :  { %2662 = vmatpush.bf16.msrb.mxu3 %v4213_v51  ;;  %v4630_v51 = vld [vmem:[#allocation10 + $0x70] sm:$0xff] }
 0x175   :  { %2824 = vmatpush.bf16.msra.mxu0 %v4620_v42  ;;  %2836 = vmatpush.bf16.msra.mxu1 %v4630_v51 }
 0x178   :  { %2663 = vmatpush.bf16.msrb.mxu3 %v4205_v41  ;;  %v4627_v41 = vld [vmem:[#allocation10 + $0x58] sm:$0xff] }
 0x179   :  { %v2042_v9 = vpop.f32.mrf.mxu0  ;;  %2825 = vmatpush.bf16.msra.mxu0 %v4619_v46  ;;  %2837 = vmatpush.bf16.msra.mxu1 %v4629_v52 }
 0x17a   :  { %v2056_v57 = vpop.f32.mrf.mxu1  ;;  %v2043_v1 = vadd.f32 %v2042_v9, %v372_v53  ;;  %v4617_v9 = vld [vmem:[#allocation10 + $0x8] sm:$0xff] }
 0x17c   :  { %2664 = vmatpush.bf16.msrb.mxu3 %v4197_v56  ;;  %v2057_v58 = vadd.f32 %v2056_v57, %v2043_v1  ;;  %v4628_v57 = vld [vmem:[#allocation10 + $0x60] sm:$0xff]  ;;  %v4625_v1 = vld [vmem:[#allocation10 + $0x48] sm:$0xff] }
 0x17d   :  { %2826 = vmatpush.bf16.msra.mxu0 %v4618_v50  ;;  %2838 = vmatpush.bf16.msra.mxu1 %v4628_v57 }
 0x180   :  { %2665 = vmatpush.bf16.msrb.mxu3 %v4189_v18 }
 0x181   :  { %v2070_v55 = vpop.f32.mrf.mxu2  ;;  %v2044_v27 = vpop.f32.mrf.mxu0  ;;  %2827 = vmatpush.bf16.msra.mxu0 %v4617_v9  ;;  %2839 = vmatpush.bf16.msra.mxu1 %v4627_v41 }
 0x182   :  { %v2084_v30 = vpop.f32.mrf.mxu3  ;;  %v2058_v17 = vpop.f32.mrf.mxu1  ;;  %v2045_v39 = vadd.f32 %v2044_v27, %v372_v53  ;;  %v2071_v20 = vadd.f32 %v2070_v55, %v2057_v58  ;;  %v2237_v55 = vld [vmem:[%s5007_s4] sm:$0x3] }
 0x183   :  { %2655 = vmatmul.bf16.vlgmr.msrb.gmra.mxu2 %v2171_v26 }
 0x184   :  { %2666 = vmatpush.bf16.msrb.mxu3 %v4181_v62  ;;  %v2059_v2 = vadd.f32 %v2058_v17, %v2045_v39  ;;  %v2085_v32 = vadd.f32 %v2084_v30, %v2071_v20  ;;  %v2239_v30 = vperm.slane %v2237_v55, 0 }
 0x185   :  { %2828 = vmatpush.bf16.msra.mxu0 %v4616_v14  ;;  %2840 = vmatpush.bf16.msra.mxu1 %v4626_v54 }
 0x188   :  { %2667 = vmatpush.bf16.msrb.mxu3 %v4173_v5 }
 0x189   :  { %v2072_v10 = vpop.f32.mrf.mxu2  ;;  %2841 = vmatpush.bf16.msra.mxu1 %v4625_v1 }
 0x18a   :  { %v2086_v44 = vpop.f32.mrf.mxu3  ;;  %v2073_v6 = vadd.f32 %v2072_v10, %v2059_v2 }
 0x18c   :  { %2668 = vmatpush.bf16.msrb.mxu3 %v4165_v12  ;;  %v2087_v15 = vadd.f32 %v2086_v44, %v2073_v6 }
 0x18d   :  { %2842 = vmatpush.bf16.msra.mxu1 %v4624_v59 }
 0x199   :  { %v2098_v4 = vpop.f32.mrf.mxu0 }
 0x19a   :  { %v2112_v47 = vpop.f32.mrf.mxu1  ;;  %v2099_v7 = vadd.f32 %v2098_v4, %v2085_v32  ;;  %v2240_v4 = vperm.slane %v2237_v55, 1 }
 0x19c   :  { %v2113_v16 = vadd.f32 %v2112_v47, %v2099_v7 }
 0x1a1   :  { %v2126_v13 = vpop.f32.mrf.mxu2  ;;  %v2100_v21 = vpop.f32.mrf.mxu0 }
 0x1a2   :  { %v2140_v19 = vpop.f32.mrf.mxu3  ;;  %v2127_v22 = vadd.f32 %v2126_v13, %v2113_v16  ;;  %v2101_v3 = vadd.f32 %v2100_v21, %v2087_v15  ;;  %v2114_v23 = vpop.f32.mrf.mxu1 }
 0x1a4   :  { %v2141_v24 = vadd.f32 %v2140_v19, %v2127_v22  ;;  %v2115_v8 = vadd.f32 %v2114_v23, %v2101_v3 }
 0x1a6   :  { %v2156_v29 = vmul.f32 0.2, %v2141_v24  ;;  %vm2148_vm6 = vcmp.ge.f32.partialorder %v2141_v24, 0.0 }
 0x1a8   :  { %v2164_v33 = vsel %vm2148_vm6, %v2141_v24, %v2156_v29 }
 0x1a9   :  { %v2128_v25 = vpop.f32.mrf.mxu2 }
 0x1aa   :  { %v2129_v26 = vadd.f32 %v2128_v25, %v2115_v8  ;;  %v2142_v49 = vpop.f32.mrf.mxu3 }
 0x1ac   :  { %v2143_v31 = vadd.f32 %v2142_v49, %v2129_v26 }
 0x1ae   :  { %vm2152_vm7 = vcmp.ge.f32.partialorder %v2143_v31, 0.0  ;;  %v2160_v34 = vmul.f32 0.2, %v2143_v31 }
 0x1b0   :  { %v2168_v35 = vsel %vm2152_vm7, %v2143_v31, %v2160_v34 }
 0x1b1   :  { %v2172_v38 = vpack.c.bf16 %v2168_v35, %v2164_v33  ;;  %v4646_v35 = vld [vmem:[%s5009_s6] ss:$0 sm:$0xff]  ;;  %s4820_s6 = smov [#allocation11]  }
 0x1b2   :  { %s2893_s9 = sshll.u32 %s4820_s6, 4  ;;  %s2894_s9 = int_to_ptr.vmem [resolvable:$true] %s2893_s9 }
 0x1b3   :  { %2613 = vmatmul.bf16.vlgmr.msra.gmra.mxu3 %v2172_v38 }
 0x1b9   :  { %v2572_v53 = vpop.f32.mrf.mxu0 }
 0x1ba   :  { %v2586_v56 = vpop.f32.mrf.mxu1  ;;  %v2573_v61 = vadd.f32 %v2572_v53, %v2239_v30 }
 0x1bc   :  { %v2587_v17 = vadd.f32 %v2586_v56, %v2573_v61 }
 0x1c1   :  { %v2574_v27 = vpop.f32.mrf.mxu0 }
 0x1c2   :  { %v2588_v39 = vpop.f32.mrf.mxu1  ;;  %v2575_v60 = vadd.f32 %v2574_v27, %v2239_v30 }
 0x1c3   :  { %2669 = vmatmul.bf16.vlgmr.msrb.gmra.mxu3 %v2172_v38 }
 0x1c4   :  { %v2589_v20 = vadd.f32 %v2588_v39, %v2575_v60 }
 0x1d9   :  { %v2628_v62 = vpop.f32.mrf.mxu0 }
 0x1da   :  { %v2642_v5 = vpop.f32.mrf.mxu1  ;;  %v2629_v6 = vadd.f32 %v2628_v62, %v2240_v4 }
 0x1dc   :  { %v2643_v15 = vadd.f32 %v2642_v5, %v2629_v6 }
 0x1e1   :  { %v2630_v11 = vpop.f32.mrf.mxu0 }
 0x1e2   :  { %v2631_v16 = vadd.f32 %v2630_v11, %v2240_v4  ;;  %v2644_v21 = vpop.f32.mrf.mxu1 }
 0x1e4   :  { %v2645_v3 = vadd.f32 %v2644_v21, %v2631_v16 }
 0x1f6   :  { %v2600_v28 = vpop.f32.mrf.mxu2 }
 0x1f7   :  { %v2601_v63 = vadd.f32 %v2600_v28, %v2587_v17 }
 0x1fe   :  { %v2602_v18 = vpop.f32.mrf.mxu2 }
 0x1ff   :  { %v2603_v2 = vadd.f32 %v2602_v18, %v2589_v20 }
 0x206   :  { %v2656_v32 = vpop.f32.mrf.mxu2 }
 0x207   :  { %v2657_v19 = vadd.f32 %v2656_v32, %v2643_v15 }
 0x20e   :  { %v2658_v22 = vpop.f32.mrf.mxu2 }
 0x20f   :  { %v2659_v24 = vadd.f32 %v2658_v22, %v2645_v3 }
 0x236   :  { %v2614_v58 = vpop.f32.mrf.mxu3 }
 0x237   :  { %v2615_v10 = vadd.f32 %v2614_v58, %v2601_v63 }
 0x239   :  { %v2679_v43 = vmul.f32 0.2, %v2615_v10  ;;  %vm2675_vm8 = vcmp.ge.f32.partialorder %v2615_v10, 0.0 }
 0x23b   :  { %v2683_v7 = vsel %vm2675_vm8, %v2615_v10, %v2679_v43 }
 0x23e   :  { %v2616_v44 = vpop.f32.mrf.mxu3 }
 0x23f   :  { %v2617_v45 = vadd.f32 %v2616_v44, %v2603_v2 }
 0x241   :  { %vm2677_vm9 = vcmp.ge.f32.partialorder %v2617_v45, 0.0  ;;  %v2681_v47 = vmul.f32 0.2, %v2617_v45 }
 0x243   :  { %v2685_v0 = vsel %vm2677_vm9, %v2617_v45, %v2681_v47 }
 0x244   :  { %v2687_v12 = vpack.c.bf16 %v2685_v0, %v2683_v7 }
 0x246   :  { %v2670_v13 = vpop.f32.mrf.mxu3  ;;  %2829 = vmatmul.bf16.vlgmr.msra.gmra.mxu0 %v2687_v12 }
 0x247   :  { %v2671_v23 = vadd.f32 %v2670_v13, %v2657_v19 }
 0x249   :  { %v2680_v25 = vmul.f32 0.2, %v2671_v23  ;;  %vm2676_vm10 = vcmp.ge.f32.partialorder %v2671_v23, 0.0 }
 0x24b   :  { %v2684_v29 = vsel %vm2676_vm10, %v2671_v23, %v2680_v25 }
 0x24e   :  { %v2672_v8 = vpop.f32.mrf.mxu3 }
 0x24f   :  { %v2673_v26 = vadd.f32 %v2672_v8, %v2659_v24 }
 0x251   :  { %vm2678_vm11 = vcmp.ge.f32.partialorder %v2673_v26, 0.0  ;;  %v2682_v49 = vmul.f32 0.2, %v2673_v26 }
 0x253   :  { %v2686_v31 = vsel %vm2678_vm11, %v2673_v26, %v2682_v49 }
 0x254   :  { %v2688_v34 = vpack.c.bf16 %v2686_v31, %v2684_v29 }
 0x256   :  { %2843 = vmatmul.bf16.vlgmr.msra.gmra.mxu1 %v2688_v34 }
 0x2c3   :  { %v2830_v33 = vpop.f32.mrf.mxu0 }
 0x2c4   :  { %v2831_v38 = vadd.f32 %v4646_v35, %v2830_v33 }
 0x2cb   :  { %v2832_v42 = vpop.f32.mrf.mxu0 }
 0x2cc   :  { %v2833_v46 = vadd.f32 %v4646_v35, %v2832_v42 }
 0x2d3   :  { %v2844_v36 = vpop.f32.mrf.mxu1 }
 0x2d4   :  { %v2845_v37 = vadd.f32 %v2844_v36, %v2831_v38 }
 0x2d6   :  { %v4286_v40 = vmul.f32 -1.442695, %v2845_v37 }
 0x2d8   :  { %4647 = vpow2.f32 %v4286_v40 }
 0x2db   :  { %v2846_v48 = vpop.f32.mrf.mxu1 }
 0x2dc   :  { %v2847_v50 = vadd.f32 %v2846_v48, %v2833_v46 }
 0x2de   :  { %v4648_v51 = vpop.eup %4647  ;;  %v4287_v9 = vmul.f32 -1.442695, %v2847_v50 }
 0x2df   :  { %v2855_v52 = vadd.f32 1.0, %v4648_v51 }
 0x2e0   :  { %4649 = vpow2.f32 %v4287_v9 }
 0x2e1   :  { %4651 = vrcp.f32 %v2855_v52  ;;  %v2868_v28 = vand.u32 2147483648, %v2855_v52  ;;  %v2866_v56 = vand.u32 2147483647, %v2855_v52  ;;  %vm2862_vm13 = vweird.f32 %v2855_v52 }
 0x2e3   :  { %v2869_v27 = vor.u32 1.1754944e-38, %v2868_v28  ;;  %vm2867_vm15 = vcmp.eq.f32.partialorder %v2866_v56, 8.507059e+37 }
 0x2e6   :  { %v4650_v14 = vpop.eup %4649 }
 0x2e7   :  { %v4652_v57 = vpop.eup %4651  ;;  %v2856_v41 = vadd.f32 1.0, %v4650_v14 }
 0x2e8   :  { %v2858_v53 = vmul.f32 %v4652_v57, %v2855_v52  ;;  %vm2863_vm12 = vweird.f32 %v4652_v57 }
 0x2e9   :  { %4653 = vrcp.f32 %v2856_v41  ;;  %vm2864_vm14 = vmor %vm2862_vm13, %vm2863_vm12  ;;  %v2883_v17 = vand.u32 2147483648, %v2856_v41  ;;  %v2881_v60 = vand.u32 2147483647, %v2856_v41  ;;  %vm2877_vm1 = vweird.f32 %v2856_v41 }
 0x2ea   :  { %v2859_v54 = vsub.f32 1.0, %v2858_v53 }
 0x2eb   :  { %v2884_v62 = vor.u32 1.1754944e-38, %v2883_v17  ;;  %vm2882_vm3 = vcmp.eq.f32.partialorder %v2881_v60, 8.507059e+37 }
 0x2ec   :  { %v2860_v55 = vmul.f32 %v4652_v57, %v2859_v54 }
 0x2ee   :  { %v2861_v1 = vadd.f32 %v4652_v57, %v2860_v55 }
 0x2ef   :  { %v4654_v30 = vpop.eup %4653 }
 0x2f0   :  { %v2873_v59 = vmul.f32 %v4654_v30, %v2856_v41  ;;  %v2865_v61 = vsel %vm2864_vm14, %v4652_v57, %v2861_v1  ;;  %vm2878_vm0 = vweird.f32 %v4654_v30 }
 0x2f1   :  { %v2870_v18 = vsel %vm2867_vm15, %v2869_v27, %v2865_v61  ;;  %vm2879_vm2 = vmor %vm2877_vm1, %vm2878_vm0 }
 0x2f2   :  { %v2874_v58 = vsub.f32 1.0, %v2873_v59  ;;  %2887 = vst [vmem:[#allocation11] sm:$0xff] %v2870_v18 }
 0x2f4   :  { %v2875_v39 = vmul.f32 %v4654_v30, %v2874_v58 }
 0x2f6   :  { %v2876_v63 = vadd.f32 %v4654_v30, %v2875_v39 }
 0x2f8   :  { %v2880_v20 = vsel %vm2879_vm2, %v4654_v30, %v2876_v63 }
 0x2f9   :  { %v2885_v10 = vsel %vm2882_vm3, %v2884_v62, %v2880_v20 }
 0x2fa   :  { %2888 = vst [vmem:[#allocation11 + $0x8] sm:$0xff] %v2885_v10 }
 0x2fb   :  { %2901 = dma.vmem_to_hbm [thread:$0]  %s2894_s9, 256, %s2896_s12, [#allocation4], %s4811_s13, %s4811_s13, %s4812_s14  }
 0x2fc   :  { %4805 = dma.done.wait [#allocation4], 256  }
 0x2fd   :  { %4806 = vsyncadd [#allocation4], 4294967040 }
 0x2fe   :  { %2906 = vsyncpa [#allocation3], 1 }
 0x2ff   :  { %2907 = vsyncpa [#allocation6], 1 }
 0x300   :  { %2908 = vsyncpa [#allocation9], 1 }
 0x301   :  { %2909 = vsyncpa [#allocation4], 1 }

</bundles_post_ra>
